<compile_context>
chip_gen: v6e
topology: v6e:2x2x1
jax: 0.10.0
libtpu: 0.0.40
codegen_flags: <defaults>
</compile_context>

<pallas_src>
import functools
import math

import jax
import jax.numpy as jnp
from jax.experimental import pallas as pl
from jax.experimental.pallas import tpu as pltpu  # imported per template; not needed at these sizes


# ----------------------------------------------------------------------------
# In-kernel helpers
# ----------------------------------------------------------------------------
def _layer_norm(x, g, b, eps=1e-5):
    mu = jnp.mean(x, axis=-1, keepdims=True)
    xc = x - mu
    var = jnp.mean(xc * xc, axis=-1, keepdims=True)
    return xc * jax.lax.rsqrt(var + eps) * g + b


# ----------------------------------------------------------------------------
# Single fused kernel: all encoder layers + classification head
# ----------------------------------------------------------------------------
def tf_model_kernel(num_heads, num_layers,
                    x_ref,        # (B*S, H)  embeddings
                    mask_ref,     # (B*S, B*S) additive bias: 0 allowed / -1e9 masked
                    sel_ref,      # (B, B*S)  one-hot CLS-row selector
                    wqkv_ref, bqkv_ref,   # (L, H, 3H), (L, 1, 3H)   (Q block pre-scaled)
                    wo_ref, bo_ref,       # (L, H, H),  (L, 1, H)
                    ln1g_ref, ln1b_ref,   # (L, 1, H)
                    w1_ref, b1_ref,       # (L, H, F),  (L, 1, F)
                    w2_ref, b2_ref,       # (L, F, H),  (L, 1, H)
                    ln2g_ref, ln2b_ref,   # (L, 1, H)
                    prjw_ref, prjb_ref,   # (H, C), (1, C)
                    o_ref):               # (B, C) log-probs
    x = x_ref[...]                         # activations stay resident across layers
    mask = mask_ref[...]
    H = x.shape[-1]
    hd = H // num_heads

    # TODO(synk): exact `transformer.TransformerEncoder` source unavailable;
    # assuming standard post-LN encoder layer (MHA -> add&norm -> ReLU FFN ->
    # add&norm) with dropout = 0 (no-op).
    for l in range(num_layers):            # static unroll over layers (weights fit VMEM)
        wqkv = wqkv_ref[l]                 # (H, 3H)
        wo = wo_ref[l]                     # (H, H)

        # fused Q/K/V projection: one MXU push instead of three
        qkv = jnp.dot(x, wqkv, preferred_element_type=jnp.float32) + bqkv_ref[l]
        q = qkv[:, 0:H]                    # already scaled by 1/sqrt(hd)
        k = qkv[:, H:2 * H]
        v = qkv[:, 2 * H:3 * H]

        # Heads stay unrolled: the (S, nH, hd) transposes needed to batch heads
        # do not lower cheaply at these sub-(8,128) sizes. The batch dimension
        # IS batched (block-diagonal mask), and the head concat is folded into
        # per-head slices of W_o rows accumulated below.
        attn = jnp.zeros_like(x)
        for h in range(num_heads):
            sl = slice(h * hd, (h + 1) * hd)
            qh, kh, vh = q[:, sl], k[:, sl], v[:, sl]
            s = jnp.dot(qh, kh.T, preferred_element_type=jnp.float32) + mask
            s = s - jnp.max(s, axis=-1, keepdims=True)
            p = jnp.exp(s)
            p = p * pl.reciprocal(jnp.sum(p, axis=-1, keepdims=True), approx=True)
            ctx = jnp.dot(p, vh, preferred_element_type=jnp.float32)        # (B*S, hd)
            attn = attn + jnp.dot(ctx, wo[sl, :],
                                  preferred_element_type=jnp.float32)       # (B*S, H)
        attn = attn + bo_ref[l]

        # post-LN + ReLU FFN
        h1 = _layer_norm(x + attn, ln1g_ref[l], ln1b_ref[l])
        f = jnp.dot(h1, w1_ref[l], preferred_element_type=jnp.float32) + b1_ref[l]
        f = jnp.maximum(f, 0.0)
        f = jnp.dot(f, w2_ref[l], preferred_element_type=jnp.float32) + b2_ref[l]
        x = _layer_norm(h1 + f, ln2g_ref[l], ln2b_ref[l])

    # CLS head inside the same kernel: gather CLS rows with a one-hot matmul
    # (avoids unaligned sublane slicing), then Linear + exact log_softmax.
    cls = jnp.dot(sel_ref[...], x, preferred_element_type=jnp.float32)       # (B, H)
    logits = jnp.dot(cls, prjw_ref[...], preferred_element_type=jnp.float32) + prjb_ref[...]
    z = logits - jnp.max(logits, axis=-1, keepdims=True)
    o_ref[...] = z - jnp.log(jnp.sum(jnp.exp(z), axis=-1, keepdims=True))


def tf_model_pallas(x_flat, mask, sel, packed, *, num_heads):
    L = packed["wqkv"].shape[0]
    B = sel.shape[0]
    C = packed["prj_w"].shape[1]
    kern = functools.partial(tf_model_kernel, num_heads, L)
    # Single invocation, no grid: whole-model fusion — every operand is a full
    # VMEM block, activations never touch HBM between layers. (For large B one
    # would reintroduce a "parallel" batch grid axis for v7x's two TensorCores.)
    return pl.pallas_call(
        kern,
        out_shape=jax.ShapeDtypeStruct((B, C), jnp.float32),
    )(x_flat, mask, sel,
      packed["wqkv"], packed["bqkv"], packed["wo"], packed["bo"],
      packed["ln1g"], packed["ln1b"], packed["w1"], packed["b1"],
      packed["w2"], packed["b2"], packed["ln2g"], packed["ln2b"],
      packed["prj_w"], packed["prj_b"])


# ----------------------------------------------------------------------------
# Wrapper-level parameter packing: fuse wq|wk|wv, fold attention scale into Q,
# stack per-layer weights along a leading L axis.
# ----------------------------------------------------------------------------
def pack_params(params, num_heads):
    H = params["layers"][0]["wq"].shape[0]
    hd = H // num_heads
    scale = 1.0 / math.sqrt(hd)

    def stack(fn):
        return jnp.stack([fn(lp) for lp in params["layers"]], axis=0)

    return dict(
        wqkv=stack(lambda p: jnp.concatenate([p["wq"] * scale, p["wk"], p["wv"]], axis=1)),
        bqkv=stack(lambda p: jnp.concatenate([p["bq"] * scale, p["bk"], p["bv"]], axis=1)),
        wo=stack(lambda p: p["wo"]),   bo=stack(lambda p: p["bo"]),
        ln1g=stack(lambda p: p["ln1g"]), ln1b=stack(lambda p: p["ln1b"]),
        w1=stack(lambda p: p["w1"]),   b1=stack(lambda p: p["b1"]),
        w2=stack(lambda p: p["w2"]),   b2=stack(lambda p: p["b2"]),
        ln2g=stack(lambda p: p["ln2g"]), ln2b=stack(lambda p: p["ln2b"]),
        word_embs=params["word_embs"],
        position_embs=params["position_embs"],
        prj_w=params["prj_w"], prj_b=params["prj_b"],
    )


# ----------------------------------------------------------------------------
# Full model forward (glue + single fused kernel)
# ----------------------------------------------------------------------------
def tf_model_forward(packed, input_ids, *, pad_index, cls_index, num_heads):
    B = input_ids.shape[0]
    cls_tokens = jnp.full((B, 1), cls_index, dtype=input_ids.dtype)
    ids = jnp.concatenate([cls_tokens, input_ids], axis=1)             # (B, S)
    S = ids.shape[1]
    H = packed["word_embs"].shape[1]

    embs = jnp.take(packed["word_embs"], ids, axis=0)                  # (B, S, H)
    pos = packed["position_embs"][:S][None, :, :]                      # (1, S, H)
    x = (embs + pos).astype(jnp.float32).reshape(B * S, H)             # batch folded into sublanes

    # additive attention bias, (B*S, B*S): block-diagonal over batches + key padding
    batch_id = jnp.repeat(jnp.arange(B), S)                            # (B*S,)
    key_pad = (ids == pad_index).reshape(B * S)
    allowed = (batch_id[:, None] == batch_id[None, :]) & jnp.logical_not(key_pad)[None, :]
    mask = jnp.where(allowed, 0.0, -1e9).astype(jnp.float32)

    # one-hot selector picking each batch's CLS row (row b*S) out of the slab
    sel = jax.nn.one_hot(jnp.arange(B) * S, B * S, dtype=jnp.float32)  # (B, B*S)

    return tf_model_pallas(x, mask, sel, packed, num_heads=num_heads)  # (B, C) log-probs


# ----------------------------------------------------------------------------
# Deterministic parameter init (std=0.02 normals for weights, zeros for biases,
# ones/zeros for LayerNorm; "word2vec" is a synthetic normal embedding table)
# ----------------------------------------------------------------------------
def init_params(key, vocab_size, hidden_size, max_len, num_layers, num_class):
    ks = iter(jax.random.split(key, 64))
    n = lambda shape: (0.02 * jax.random.normal(next(ks), shape)).astype(jnp.float32)
    z = lambda shape: jnp.zeros(shape, jnp.float32)
    o = lambda shape: jnp.ones(shape, jnp.float32)

    H, F = hidden_size, 4 * hidden_size
    layers = []
    for _ in range(num_layers):
        layers.append(dict(
            wq=n((H, H)), bq=z((1, H)), wk=n((H, H)), bk=z((1, H)),
            wv=n((H, H)), bv=z((1, H)), wo=n((H, H)), bo=z((1, H)),
            ln1g=o((1, H)), ln1b=z((1, H)),
            w1=n((H, F)), b1=z((1, F)), w2=n((F, H)), b2=z((1, H)),
            ln2g=o((1, H)), ln2b=z((1, H)),
        ))
    return dict(
        word_embs=n((vocab_size, H)),          # stands in for word2vec weights
        position_embs=n((max_len + 1, H)),
        layers=layers,
        prj_w=n((H, num_class)),
        prj_b=z((1, num_class)),
    )


if __name__ == "__main__":
    # small shapes consistent with the module
    batch, seq = 2, 8
    vocab_size, hidden_size, max_len = 32, 32, 8
    pad_index, cls_index = 0, 1
    num_class, num_heads, num_layers = 2, 4, 1

    key = jax.random.PRNGKey(0)
    kp, kx = jax.random.split(key)
    params = init_params(kp, vocab_size, hidden_size, max_len, num_layers, num_class)
    packed = pack_params(params, num_heads)          # one-time wrapper-level packing

    input_ids = jax.random.randint(kx, (batch, seq), 0, vocab_size, dtype=jnp.int32)
    # force a couple of pad tokens so the attention mask is exercised
    input_ids = input_ids.at[:, -2:].set(pad_index)

    fwd = jax.jit(functools.partial(
        tf_model_forward, pad_index=pad_index, cls_index=cls_index, num_heads=num_heads))
    out = jax.block_until_ready(fwd(packed, input_ids))

    assert out.shape == (batch, num_class)
    assert bool(jnp.all(jnp.isfinite(out)))
    # log_softmax rows should exponentiate-and-sum to ~1
    assert bool(jnp.allclose(jnp.sum(jnp.exp(out), axis=-1), 1.0, atol=1e-4))
    print("KERNEL_OK")
</pallas_src>

<mosaic_0001>
module attributes {stable_mosaic.version = 11 : i64} {
  func.func @tf_model_kernel(%arg0: memref<18x32xf32, #tpu.memory_space<vmem>>, %arg1: memref<18x18xf32, #tpu.memory_space<vmem>>, %arg2: memref<2x18xf32, #tpu.memory_space<vmem>>, %arg3: memref<1x32x96xf32, #tpu.memory_space<vmem>>, %arg4: memref<1x1x96xf32, #tpu.memory_space<vmem>>, %arg5: memref<1x32x32xf32, #tpu.memory_space<vmem>>, %arg6: memref<1x1x32xf32, #tpu.memory_space<vmem>>, %arg7: memref<1x1x32xf32, #tpu.memory_space<vmem>>, %arg8: memref<1x1x32xf32, #tpu.memory_space<vmem>>, %arg9: memref<1x32x128xf32, #tpu.memory_space<vmem>>, %arg10: memref<1x1x128xf32, #tpu.memory_space<vmem>>, %arg11: memref<1x128x32xf32, #tpu.memory_space<vmem>>, %arg12: memref<1x1x32xf32, #tpu.memory_space<vmem>>, %arg13: memref<1x1x32xf32, #tpu.memory_space<vmem>>, %arg14: memref<1x1x32xf32, #tpu.memory_space<vmem>>, %arg15: memref<32x2xf32, #tpu.memory_space<vmem>>, %arg16: memref<1x2xf32, #tpu.memory_space<vmem>>, %arg17: memref<2x2xf32, #tpu.memory_space<vmem>>) attributes {dimension_semantics = [], scalar_prefetch = 0 : i64, scratch_operands = 0 : i64, tpu.core_type = #tpu.core_type<tc>} {
    %c0 = arith.constant 0 : index
    %c0_0 = arith.constant 0 : index
    %0 = vector.load %arg0[%c0, %c0_0] : memref<18x32xf32, #tpu.memory_space<vmem>>, vector<18x32xf32>
    %c0_1 = arith.constant 0 : index
    %c0_2 = arith.constant 0 : index
    %1 = vector.load %arg1[%c0_1, %c0_2] : memref<18x18xf32, #tpu.memory_space<vmem>>, vector<18x18xf32>
    %c0_3 = arith.constant 0 : index
    %c0_4 = arith.constant 0 : index
    %c0_5 = arith.constant 0 : index
    %2 = vector.load %arg3[%c0_3, %c0_4, %c0_5] : memref<1x32x96xf32, #tpu.memory_space<vmem>>, vector<1x32x96xf32>
    %3 = vector.shape_cast %2 : vector<1x32x96xf32> to vector<32x96xf32>
    %c0_6 = arith.constant 0 : index
    %c0_7 = arith.constant 0 : index
    %c0_8 = arith.constant 0 : index
    %4 = vector.load %arg5[%c0_6, %c0_7, %c0_8] : memref<1x32x32xf32, #tpu.memory_space<vmem>>, vector<1x32x32xf32>
    %5 = vector.shape_cast %4 : vector<1x32x32xf32> to vector<32x32xf32>
    %cst = arith.constant dense<0.000000e+00> : vector<18x96xf32>
    %6 = tpu.matmul %0, %3, %cst {dimension_numbers = #tpu.dot_dimension_numbers<[1], [0], [0], [1], [0, 0, 1, 1], [], []>} : vector<18x32xf32>, vector<32x96xf32>, vector<18x96xf32> -> vector<18x96xf32>
    %c0_9 = arith.constant 0 : index
    %c0_10 = arith.constant 0 : index
    %c0_11 = arith.constant 0 : index
    %7 = vector.load %arg4[%c0_9, %c0_10, %c0_11] : memref<1x1x96xf32, #tpu.memory_space<vmem>>, vector<1x1x96xf32>
    %8 = vector.shape_cast %7 : vector<1x1x96xf32> to vector<1x96xf32>
    %9 = vector.broadcast %8 : vector<1x96xf32> to vector<18x96xf32>
    %10 = arith.addf %6, %9 : vector<18x96xf32>
    %11 = vector.extract_strided_slice %10 {offsets = [0, 0], sizes = [18, 32], strides = [1, 1]} : vector<18x96xf32> to vector<18x32xf32>
    %12 = vector.extract_strided_slice %10 {offsets = [0, 32], sizes = [18, 32], strides = [1, 1]} : vector<18x96xf32> to vector<18x32xf32>
    %13 = vector.extract_strided_slice %10 {offsets = [0, 64], sizes = [18, 32], strides = [1, 1]} : vector<18x96xf32> to vector<18x32xf32>
    %cst_12 = arith.constant 0.000000e+00 : f32
    %14 = vector.broadcast %cst_12 : f32 to vector<18x32xf32>
    %15 = vector.extract_strided_slice %11 {offsets = [0, 0], sizes = [18, 8], strides = [1, 1]} : vector<18x32xf32> to vector<18x8xf32>
    %16 = vector.extract_strided_slice %12 {offsets = [0, 0], sizes = [18, 8], strides = [1, 1]} : vector<18x32xf32> to vector<18x8xf32>
    %17 = vector.extract_strided_slice %13 {offsets = [0, 0], sizes = [18, 8], strides = [1, 1]} : vector<18x32xf32> to vector<18x8xf32>
    %18 = tpu.transpose %16, [1, 0] : vector<18x8xf32> -> vector<8x18xf32>
    %cst_13 = arith.constant dense<0.000000e+00> : vector<18x18xf32>
    %19 = tpu.matmul %15, %18, %cst_13 {dimension_numbers = #tpu.dot_dimension_numbers<[1], [0], [0], [1], [0, 0, 1, 1], [], []>} : vector<18x8xf32>, vector<8x18xf32>, vector<18x18xf32> -> vector<18x18xf32>
    %20 = arith.addf %19, %1 : vector<18x18xf32>
    %cst_14 = arith.constant dense<0xFF800000> : vector<18xf32>
    %21 = vector.multi_reduction <maximumf>, %20, %cst_14 [1] : vector<18x18xf32> to vector<18xf32>
    %22 = vector.shape_cast %21 : vector<18xf32> to vector<18x1xf32>
    %23 = vector.broadcast %22 : vector<18x1xf32> to vector<18x18xf32>
    %24 = arith.subf %20, %23 : vector<18x18xf32>
    %25 = math.exp %24 : vector<18x18xf32>
    %cst_15 = arith.constant dense<0.000000e+00> : vector<18xf32>
    %26 = vector.multi_reduction <add>, %25, %cst_15 [1] : vector<18x18xf32> to vector<18xf32>
    %27 = vector.shape_cast %26 : vector<18xf32> to vector<18x1xf32>
    %28 = tpu.reciprocal %27 {approx = true} : vector<18x1xf32> -> vector<18x1xf32>
    %29 = vector.broadcast %28 : vector<18x1xf32> to vector<18x18xf32>
    %30 = arith.mulf %25, %29 : vector<18x18xf32>
    %cst_16 = arith.constant dense<0.000000e+00> : vector<18x8xf32>
    %31 = tpu.matmul %30, %17, %cst_16 {dimension_numbers = #tpu.dot_dimension_numbers<[1], [0], [0], [1], [0, 0, 1, 1], [], []>} : vector<18x18xf32>, vector<18x8xf32>, vector<18x8xf32> -> vector<18x8xf32>
    %32 = vector.extract_strided_slice %5 {offsets = [0, 0], sizes = [8, 32], strides = [1, 1]} : vector<32x32xf32> to vector<8x32xf32>
    %cst_17 = arith.constant dense<0.000000e+00> : vector<18x32xf32>
    %33 = tpu.matmul %31, %32, %cst_17 {dimension_numbers = #tpu.dot_dimension_numbers<[1], [0], [0], [1], [0, 0, 1, 1], [], []>} : vector<18x8xf32>, vector<8x32xf32>, vector<18x32xf32> -> vector<18x32xf32>
    %34 = arith.addf %14, %33 : vector<18x32xf32>
    %35 = vector.extract_strided_slice %11 {offsets = [0, 8], sizes = [18, 8], strides = [1, 1]} : vector<18x32xf32> to vector<18x8xf32>
    %36 = vector.extract_strided_slice %12 {offsets = [0, 8], sizes = [18, 8], strides = [1, 1]} : vector<18x32xf32> to vector<18x8xf32>
    %37 = vector.extract_strided_slice %13 {offsets = [0, 8], sizes = [18, 8], strides = [1, 1]} : vector<18x32xf32> to vector<18x8xf32>
    %38 = tpu.transpose %36, [1, 0] : vector<18x8xf32> -> vector<8x18xf32>
    %cst_18 = arith.constant dense<0.000000e+00> : vector<18x18xf32>
    %39 = tpu.matmul %35, %38, %cst_18 {dimension_numbers = #tpu.dot_dimension_numbers<[1], [0], [0], [1], [0, 0, 1, 1], [], []>} : vector<18x8xf32>, vector<8x18xf32>, vector<18x18xf32> -> vector<18x18xf32>
    %40 = arith.addf %39, %1 : vector<18x18xf32>
    %cst_19 = arith.constant dense<0xFF800000> : vector<18xf32>
    %41 = vector.multi_reduction <maximumf>, %40, %cst_19 [1] : vector<18x18xf32> to vector<18xf32>
    %42 = vector.shape_cast %41 : vector<18xf32> to vector<18x1xf32>
    %43 = vector.broadcast %42 : vector<18x1xf32> to vector<18x18xf32>
    %44 = arith.subf %40, %43 : vector<18x18xf32>
    %45 = math.exp %44 : vector<18x18xf32>
    %cst_20 = arith.constant dense<0.000000e+00> : vector<18xf32>
    %46 = vector.multi_reduction <add>, %45, %cst_20 [1] : vector<18x18xf32> to vector<18xf32>
    %47 = vector.shape_cast %46 : vector<18xf32> to vector<18x1xf32>
    %48 = tpu.reciprocal %47 {approx = true} : vector<18x1xf32> -> vector<18x1xf32>
    %49 = vector.broadcast %48 : vector<18x1xf32> to vector<18x18xf32>
    %50 = arith.mulf %45, %49 : vector<18x18xf32>
    %cst_21 = arith.constant dense<0.000000e+00> : vector<18x8xf32>
    %51 = tpu.matmul %50, %37, %cst_21 {dimension_numbers = #tpu.dot_dimension_numbers<[1], [0], [0], [1], [0, 0, 1, 1], [], []>} : vector<18x18xf32>, vector<18x8xf32>, vector<18x8xf32> -> vector<18x8xf32>
    %52 = vector.extract_strided_slice %5 {offsets = [8, 0], sizes = [8, 32], strides = [1, 1]} : vector<32x32xf32> to vector<8x32xf32>
    %cst_22 = arith.constant dense<0.000000e+00> : vector<18x32xf32>
    %53 = tpu.matmul %51, %52, %cst_22 {dimension_numbers = #tpu.dot_dimension_numbers<[1], [0], [0], [1], [0, 0, 1, 1], [], []>} : vector<18x8xf32>, vector<8x32xf32>, vector<18x32xf32> -> vector<18x32xf32>
    %54 = arith.addf %34, %53 : vector<18x32xf32>
    %55 = vector.extract_strided_slice %11 {offsets = [0, 16], sizes = [18, 8], strides = [1, 1]} : vector<18x32xf32> to vector<18x8xf32>
    %56 = vector.extract_strided_slice %12 {offsets = [0, 16], sizes = [18, 8], strides = [1, 1]} : vector<18x32xf32> to vector<18x8xf32>
    %57 = vector.extract_strided_slice %13 {offsets = [0, 16], sizes = [18, 8], strides = [1, 1]} : vector<18x32xf32> to vector<18x8xf32>
    %58 = tpu.transpose %56, [1, 0] : vector<18x8xf32> -> vector<8x18xf32>
    %cst_23 = arith.constant dense<0.000000e+00> : vector<18x18xf32>
    %59 = tpu.matmul %55, %58, %cst_23 {dimension_numbers = #tpu.dot_dimension_numbers<[1], [0], [0], [1], [0, 0, 1, 1], [], []>} : vector<18x8xf32>, vector<8x18xf32>, vector<18x18xf32> -> vector<18x18xf32>
    %60 = arith.addf %59, %1 : vector<18x18xf32>
    %cst_24 = arith.constant dense<0xFF800000> : vector<18xf32>
    %61 = vector.multi_reduction <maximumf>, %60, %cst_24 [1] : vector<18x18xf32> to vector<18xf32>
    %62 = vector.shape_cast %61 : vector<18xf32> to vector<18x1xf32>
    %63 = vector.broadcast %62 : vector<18x1xf32> to vector<18x18xf32>
    %64 = arith.subf %60, %63 : vector<18x18xf32>
    %65 = math.exp %64 : vector<18x18xf32>
    %cst_25 = arith.constant dense<0.000000e+00> : vector<18xf32>
    %66 = vector.multi_reduction <add>, %65, %cst_25 [1] : vector<18x18xf32> to vector<18xf32>
    %67 = vector.shape_cast %66 : vector<18xf32> to vector<18x1xf32>
    %68 = tpu.reciprocal %67 {approx = true} : vector<18x1xf32> -> vector<18x1xf32>
    %69 = vector.broadcast %68 : vector<18x1xf32> to vector<18x18xf32>
    %70 = arith.mulf %65, %69 : vector<18x18xf32>
    %cst_26 = arith.constant dense<0.000000e+00> : vector<18x8xf32>
    %71 = tpu.matmul %70, %57, %cst_26 {dimension_numbers = #tpu.dot_dimension_numbers<[1], [0], [0], [1], [0, 0, 1, 1], [], []>} : vector<18x18xf32>, vector<18x8xf32>, vector<18x8xf32> -> vector<18x8xf32>
    %72 = vector.extract_strided_slice %5 {offsets = [16, 0], sizes = [8, 32], strides = [1, 1]} : vector<32x32xf32> to vector<8x32xf32>
    %cst_27 = arith.constant dense<0.000000e+00> : vector<18x32xf32>
    %73 = tpu.matmul %71, %72, %cst_27 {dimension_numbers = #tpu.dot_dimension_numbers<[1], [0], [0], [1], [0, 0, 1, 1], [], []>} : vector<18x8xf32>, vector<8x32xf32>, vector<18x32xf32> -> vector<18x32xf32>
    %74 = arith.addf %54, %73 : vector<18x32xf32>
    %75 = vector.extract_strided_slice %11 {offsets = [0, 24], sizes = [18, 8], strides = [1, 1]} : vector<18x32xf32> to vector<18x8xf32>
    %76 = vector.extract_strided_slice %12 {offsets = [0, 24], sizes = [18, 8], strides = [1, 1]} : vector<18x32xf32> to vector<18x8xf32>
    %77 = vector.extract_strided_slice %13 {offsets = [0, 24], sizes = [18, 8], strides = [1, 1]} : vector<18x32xf32> to vector<18x8xf32>
    %78 = tpu.transpose %76, [1, 0] : vector<18x8xf32> -> vector<8x18xf32>
    %cst_28 = arith.constant dense<0.000000e+00> : vector<18x18xf32>
    %79 = tpu.matmul %75, %78, %cst_28 {dimension_numbers = #tpu.dot_dimension_numbers<[1], [0], [0], [1], [0, 0, 1, 1], [], []>} : vector<18x8xf32>, vector<8x18xf32>, vector<18x18xf32> -> vector<18x18xf32>
    %80 = arith.addf %79, %1 : vector<18x18xf32>
    %cst_29 = arith.constant dense<0xFF800000> : vector<18xf32>
    %81 = vector.multi_reduction <maximumf>, %80, %cst_29 [1] : vector<18x18xf32> to vector<18xf32>
    %82 = vector.shape_cast %81 : vector<18xf32> to vector<18x1xf32>
    %83 = vector.broadcast %82 : vector<18x1xf32> to vector<18x18xf32>
    %84 = arith.subf %80, %83 : vector<18x18xf32>
    %85 = math.exp %84 : vector<18x18xf32>
    %cst_30 = arith.constant dense<0.000000e+00> : vector<18xf32>
    %86 = vector.multi_reduction <add>, %85, %cst_30 [1] : vector<18x18xf32> to vector<18xf32>
    %87 = vector.shape_cast %86 : vector<18xf32> to vector<18x1xf32>
    %88 = tpu.reciprocal %87 {approx = true} : vector<18x1xf32> -> vector<18x1xf32>
    %89 = vector.broadcast %88 : vector<18x1xf32> to vector<18x18xf32>
    %90 = arith.mulf %85, %89 : vector<18x18xf32>
    %cst_31 = arith.constant dense<0.000000e+00> : vector<18x8xf32>
    %91 = tpu.matmul %90, %77, %cst_31 {dimension_numbers = #tpu.dot_dimension_numbers<[1], [0], [0], [1], [0, 0, 1, 1], [], []>} : vector<18x18xf32>, vector<18x8xf32>, vector<18x8xf32> -> vector<18x8xf32>
    %92 = vector.extract_strided_slice %5 {offsets = [24, 0], sizes = [8, 32], strides = [1, 1]} : vector<32x32xf32> to vector<8x32xf32>
    %cst_32 = arith.constant dense<0.000000e+00> : vector<18x32xf32>
    %93 = tpu.matmul %91, %92, %cst_32 {dimension_numbers = #tpu.dot_dimension_numbers<[1], [0], [0], [1], [0, 0, 1, 1], [], []>} : vector<18x8xf32>, vector<8x32xf32>, vector<18x32xf32> -> vector<18x32xf32>
    %94 = arith.addf %74, %93 : vector<18x32xf32>
    %c0_33 = arith.constant 0 : index
    %c0_34 = arith.constant 0 : index
    %c0_35 = arith.constant 0 : index
    %95 = vector.load %arg6[%c0_33, %c0_34, %c0_35] : memref<1x1x32xf32, #tpu.memory_space<vmem>>, vector<1x1x32xf32>
    %96 = vector.shape_cast %95 : vector<1x1x32xf32> to vector<1x32xf32>
    %97 = vector.broadcast %96 : vector<1x32xf32> to vector<18x32xf32>
    %98 = arith.addf %94, %97 : vector<18x32xf32>
    %99 = arith.addf %0, %98 : vector<18x32xf32>
    %c0_36 = arith.constant 0 : index
    %c0_37 = arith.constant 0 : index
    %c0_38 = arith.constant 0 : index
    %100 = vector.load %arg7[%c0_36, %c0_37, %c0_38] : memref<1x1x32xf32, #tpu.memory_space<vmem>>, vector<1x1x32xf32>
    %101 = vector.shape_cast %100 : vector<1x1x32xf32> to vector<1x32xf32>
    %c0_39 = arith.constant 0 : index
    %c0_40 = arith.constant 0 : index
    %c0_41 = arith.constant 0 : index
    %102 = vector.load %arg8[%c0_39, %c0_40, %c0_41] : memref<1x1x32xf32, #tpu.memory_space<vmem>>, vector<1x1x32xf32>
    %103 = vector.shape_cast %102 : vector<1x1x32xf32> to vector<1x32xf32>
    %cst_42 = arith.constant dense<0.000000e+00> : vector<18xf32>
    %104 = vector.multi_reduction <add>, %99, %cst_42 [1] : vector<18x32xf32> to vector<18xf32>
    %105 = vector.shape_cast %104 : vector<18xf32> to vector<18x1xf32>
    %cst_43 = arith.constant 3.200000e+01 : f32
    %106 = vector.broadcast %cst_43 : f32 to vector<18x1xf32>
    %107 = arith.divf %105, %106 : vector<18x1xf32>
    %108 = vector.broadcast %107 : vector<18x1xf32> to vector<18x32xf32>
    %109 = arith.subf %99, %108 : vector<18x32xf32>
    %110 = arith.mulf %109, %109 : vector<18x32xf32>
    %cst_44 = arith.constant dense<0.000000e+00> : vector<18xf32>
    %111 = vector.multi_reduction <add>, %110, %cst_44 [1] : vector<18x32xf32> to vector<18xf32>
    %112 = vector.shape_cast %111 : vector<18xf32> to vector<18x1xf32>
    %cst_45 = arith.constant 3.200000e+01 : f32
    %113 = vector.broadcast %cst_45 : f32 to vector<18x1xf32>
    %114 = arith.divf %112, %113 : vector<18x1xf32>
    %cst_46 = arith.constant 9.99999974E-6 : f32
    %115 = vector.broadcast %cst_46 : f32 to vector<18x1xf32>
    %116 = arith.addf %114, %115 : vector<18x1xf32>
    %117 = math.rsqrt %116 : vector<18x1xf32>
    %118 = vector.broadcast %117 : vector<18x1xf32> to vector<18x32xf32>
    %119 = arith.mulf %109, %118 : vector<18x32xf32>
    %120 = vector.broadcast %101 : vector<1x32xf32> to vector<18x32xf32>
    %121 = arith.mulf %119, %120 : vector<18x32xf32>
    %122 = vector.broadcast %103 : vector<1x32xf32> to vector<18x32xf32>
    %123 = arith.addf %121, %122 : vector<18x32xf32>
    %c0_47 = arith.constant 0 : index
    %c0_48 = arith.constant 0 : index
    %c0_49 = arith.constant 0 : index
    %124 = vector.load %arg9[%c0_47, %c0_48, %c0_49] : memref<1x32x128xf32, #tpu.memory_space<vmem>>, vector<1x32x128xf32>
    %125 = vector.shape_cast %124 : vector<1x32x128xf32> to vector<32x128xf32>
    %cst_50 = arith.constant dense<0.000000e+00> : vector<18x128xf32>
    %126 = tpu.matmul %123, %125, %cst_50 {dimension_numbers = #tpu.dot_dimension_numbers<[1], [0], [0], [1], [0, 0, 1, 1], [], []>} : vector<18x32xf32>, vector<32x128xf32>, vector<18x128xf32> -> vector<18x128xf32>
    %c0_51 = arith.constant 0 : index
    %c0_52 = arith.constant 0 : index
    %c0_53 = arith.constant 0 : index
    %127 = vector.load %arg10[%c0_51, %c0_52, %c0_53] : memref<1x1x128xf32, #tpu.memory_space<vmem>>, vector<1x1x128xf32>
    %128 = vector.shape_cast %127 : vector<1x1x128xf32> to vector<1x128xf32>
    %129 = vector.broadcast %128 : vector<1x128xf32> to vector<18x128xf32>
    %130 = arith.addf %126, %129 : vector<18x128xf32>
    %cst_54 = arith.constant 0.000000e+00 : f32
    %131 = vector.broadcast %cst_54 : f32 to vector<18x128xf32>
    %132 = arith.maximumf %130, %131 : vector<18x128xf32>
    %c0_55 = arith.constant 0 : index
    %c0_56 = arith.constant 0 : index
    %c0_57 = arith.constant 0 : index
    %133 = vector.load %arg11[%c0_55, %c0_56, %c0_57] : memref<1x128x32xf32, #tpu.memory_space<vmem>>, vector<1x128x32xf32>
    %134 = vector.shape_cast %133 : vector<1x128x32xf32> to vector<128x32xf32>
    %cst_58 = arith.constant dense<0.000000e+00> : vector<18x32xf32>
    %135 = tpu.matmul %132, %134, %cst_58 {dimension_numbers = #tpu.dot_dimension_numbers<[1], [0], [0], [1], [0, 0, 1, 1], [], []>} : vector<18x128xf32>, vector<128x32xf32>, vector<18x32xf32> -> vector<18x32xf32>
    %c0_59 = arith.constant 0 : index
    %c0_60 = arith.constant 0 : index
    %c0_61 = arith.constant 0 : index
    %136 = vector.load %arg12[%c0_59, %c0_60, %c0_61] : memref<1x1x32xf32, #tpu.memory_space<vmem>>, vector<1x1x32xf32>
    %137 = vector.shape_cast %136 : vector<1x1x32xf32> to vector<1x32xf32>
    %138 = vector.broadcast %137 : vector<1x32xf32> to vector<18x32xf32>
    %139 = arith.addf %135, %138 : vector<18x32xf32>
    %140 = arith.addf %123, %139 : vector<18x32xf32>
    %c0_62 = arith.constant 0 : index
    %c0_63 = arith.constant 0 : index
    %c0_64 = arith.constant 0 : index
    %141 = vector.load %arg13[%c0_62, %c0_63, %c0_64] : memref<1x1x32xf32, #tpu.memory_space<vmem>>, vector<1x1x32xf32>
    %142 = vector.shape_cast %141 : vector<1x1x32xf32> to vector<1x32xf32>
    %c0_65 = arith.constant 0 : index
    %c0_66 = arith.constant 0 : index
    %c0_67 = arith.constant 0 : index
    %143 = vector.load %arg14[%c0_65, %c0_66, %c0_67] : memref<1x1x32xf32, #tpu.memory_space<vmem>>, vector<1x1x32xf32>
    %144 = vector.shape_cast %143 : vector<1x1x32xf32> to vector<1x32xf32>
    %cst_68 = arith.constant dense<0.000000e+00> : vector<18xf32>
    %145 = vector.multi_reduction <add>, %140, %cst_68 [1] : vector<18x32xf32> to vector<18xf32>
    %146 = vector.shape_cast %145 : vector<18xf32> to vector<18x1xf32>
    %cst_69 = arith.constant 3.200000e+01 : f32
    %147 = vector.broadcast %cst_69 : f32 to vector<18x1xf32>
    %148 = arith.divf %146, %147 : vector<18x1xf32>
    %149 = vector.broadcast %148 : vector<18x1xf32> to vector<18x32xf32>
    %150 = arith.subf %140, %149 : vector<18x32xf32>
    %151 = arith.mulf %150, %150 : vector<18x32xf32>
    %cst_70 = arith.constant dense<0.000000e+00> : vector<18xf32>
    %152 = vector.multi_reduction <add>, %151, %cst_70 [1] : vector<18x32xf32> to vector<18xf32>
    %153 = vector.shape_cast %152 : vector<18xf32> to vector<18x1xf32>
    %cst_71 = arith.constant 3.200000e+01 : f32
    %154 = vector.broadcast %cst_71 : f32 to vector<18x1xf32>
    %155 = arith.divf %153, %154 : vector<18x1xf32>
    %cst_72 = arith.constant 9.99999974E-6 : f32
    %156 = vector.broadcast %cst_72 : f32 to vector<18x1xf32>
    %157 = arith.addf %155, %156 : vector<18x1xf32>
    %158 = math.rsqrt %157 : vector<18x1xf32>
    %159 = vector.broadcast %158 : vector<18x1xf32> to vector<18x32xf32>
    %160 = arith.mulf %150, %159 : vector<18x32xf32>
    %161 = vector.broadcast %142 : vector<1x32xf32> to vector<18x32xf32>
    %162 = arith.mulf %160, %161 : vector<18x32xf32>
    %163 = vector.broadcast %144 : vector<1x32xf32> to vector<18x32xf32>
    %164 = arith.addf %162, %163 : vector<18x32xf32>
    %c0_73 = arith.constant 0 : index
    %c0_74 = arith.constant 0 : index
    %165 = vector.load %arg2[%c0_73, %c0_74] : memref<2x18xf32, #tpu.memory_space<vmem>>, vector<2x18xf32>
    %cst_75 = arith.constant dense<0.000000e+00> : vector<2x32xf32>
    %166 = tpu.matmul %165, %164, %cst_75 {dimension_numbers = #tpu.dot_dimension_numbers<[1], [0], [0], [1], [0, 0, 1, 1], [], []>} : vector<2x18xf32>, vector<18x32xf32>, vector<2x32xf32> -> vector<2x32xf32>
    %c0_76 = arith.constant 0 : index
    %c0_77 = arith.constant 0 : index
    %167 = vector.load %arg15[%c0_76, %c0_77] : memref<32x2xf32, #tpu.memory_space<vmem>>, vector<32x2xf32>
    %cst_78 = arith.constant dense<0.000000e+00> : vector<2x2xf32>
    %168 = tpu.matmul %166, %167, %cst_78 {dimension_numbers = #tpu.dot_dimension_numbers<[1], [0], [0], [1], [0, 0, 1, 1], [], []>} : vector<2x32xf32>, vector<32x2xf32>, vector<2x2xf32> -> vector<2x2xf32>
    %c0_79 = arith.constant 0 : index
    %c0_80 = arith.constant 0 : index
    %169 = vector.load %arg16[%c0_79, %c0_80] : memref<1x2xf32, #tpu.memory_space<vmem>>, vector<1x2xf32>
    %170 = vector.broadcast %169 : vector<1x2xf32> to vector<2x2xf32>
    %171 = arith.addf %168, %170 : vector<2x2xf32>
    %cst_81 = arith.constant dense<0xFF800000> : vector<2xf32>
    %172 = vector.multi_reduction <maximumf>, %171, %cst_81 [1] : vector<2x2xf32> to vector<2xf32>
    %173 = vector.shape_cast %172 : vector<2xf32> to vector<2x1xf32>
    %174 = vector.broadcast %173 : vector<2x1xf32> to vector<2x2xf32>
    %175 = arith.subf %171, %174 : vector<2x2xf32>
    %176 = math.exp %175 : vector<2x2xf32>
    %cst_82 = arith.constant dense<0.000000e+00> : vector<2xf32>
    %177 = vector.multi_reduction <add>, %176, %cst_82 [1] : vector<2x2xf32> to vector<2xf32>
    %178 = vector.shape_cast %177 : vector<2xf32> to vector<2x1xf32>
    %179 = math.log %178 : vector<2x1xf32>
    %180 = vector.broadcast %179 : vector<2x1xf32> to vector<2x2xf32>
    %181 = arith.subf %175, %180 : vector<2x2xf32>
    %c0_83 = arith.constant 0 : index
    %c0_84 = arith.constant 0 : index
    %182 = vector.load %arg17[%c0_83, %c0_84] : memref<2x2xf32, #tpu.memory_space<vmem>>, vector<2x2xf32>
    tpu.vector_store %arg17[%c0_83, %c0_84], %181 {strides = array<i32>} : memref<2x2xf32, #tpu.memory_space<vmem>>, vector<2x2xf32>,
    return
  }
}

</mosaic_0001>

<bundles_post_ra>
// kernel: tf_model_forward.1
= control target key start
LH: loop header
LB: loop body
LE: loop exit
PB: predicated region body
PF: predicated region fallthrough
CT: control target
= control target key end

     0   :  { %s3163_s0 = inlined_call_operand.vmem [shape: f32[18,32], index: 0, kind: input, shape index: {}]   ;;  %s3164_s1 = inlined_call_operand.vmem [shape: f32[18,18], index: 1, kind: input, shape index: {}]   ;;  %s3165_s2 = inlined_call_operand.vmem [shape: f32[2,18], index: 2, kind: input, shape index: {}]   ;;  %s3166_s3 = inlined_call_operand.vmem [shape: f32[1,32,96], index: 3, kind: input, shape index: {}]   ;;  %s3167_s4 = inlined_call_operand.vmem [shape: f32[1,1,96], index: 4, kind: input, shape index: {}]   ;;  %s3168_s5 = inlined_call_operand.vmem [shape: f32[1,32,32], index: 5, kind: input, shape index: {}]   ;;  %s3169_s6 = inlined_call_operand.vmem [shape: f32[1,1,32], index: 6, kind: input, shape index: {}]   ;;  %s3170_s7 = inlined_call_operand.vmem [shape: f32[1,1,32], index: 7, kind: input, shape index: {}]   ;;  %s3171_s8 = inlined_call_operand.vmem [shape: f32[1,1,32], index: 8, kind: input, shape index: {}]   ;;  %s3172_s9 = inlined_call_operand.vmem [shape: f32[1,32,128], index: 9, kind: input, shape index: {}]   ;;  %s3173_s10 = inlined_call_operand.vmem [shape: f32[1,1,128], index: 10, kind: input, shape index: {}]   ;;  %s3174_s11 = inlined_call_operand.vmem [shape: f32[1,128,32], index: 11, kind: input, shape index: {}]   ;;  %s3175_s12 = inlined_call_operand.vmem [shape: f32[1,1,32], index: 12, kind: input, shape index: {}]   ;;  %s3176_s13 = inlined_call_operand.vmem [shape: f32[1,1,32], index: 13, kind: input, shape index: {}]   ;;  %s3177_s14 = inlined_call_operand.vmem [shape: f32[1,1,32], index: 14, kind: input, shape index: {}]   ;;  %s3178_s15 = inlined_call_operand.vmem [shape: f32[32,2], index: 15, kind: input, shape index: {}]   ;;  %s3179_s16 = inlined_call_operand.vmem [shape: f32[1,2], index: 16, kind: input, shape index: {}]   ;;  %s3180_s17 = inlined_call_operand.hbm [shape: f32[2,2], index: 17, kind: output, shape index: {}]  }
   0x1   :  { %3183 = sst [smem:[#allocation5_spill]] %s3163_s0 }
   0x2   :  { %3184 = sst [smem:[#allocation6_spill]] %s3164_s1 }
   0x3   :  { %v66_v0 = vld [vmem:[%s3166_s3 + $0x18] sm:$0xff]  ;;  %v2547_v1 = vmov 0.0   ;;  %v65_v2 = vld [vmem:[%s3166_s3 + $0x10] sm:$0xff]  ;;  %vm2548_vm0 = vmmov 0  }
   0x4   :  { %2182 = vmatprep.subr.mxu1 %v2547_v1  ;;  %2190 = vmatprep.mubr.msk.f32.mxu1 %vm2548_vm0, %v2547_v1 }
   0x5   :  { %2183 = vmatpush3.msra.mxu1 %v66_v0  ;;  %2214 = vmatprep.subr.mxu0 %v2547_v1 }
   0x6   :  { %22 = vsyncpa [#allocation3], 0  ;;  %2184 = vmatprep.subr.mxu1 %v2547_v1  ;;  %v64_v3 = vld [vmem:[%s3166_s3 + $0x8] sm:$0xff]  ;;  %2220 = vmatprep.mubr.msk.f32.mxu0 %vm2548_vm0, %v2547_v1  ;;  %v63_v4 = vld [vmem:[%s3166_s3] sm:$0xff]  ;;  %s3185_s1 = sld [smem:[#allocation5_spill]]  ;;  %vm78_vm1 = vcmask 261120  }
   0x7   :  { %2185 = vmatpush3.msra.mxu1 %v65_v2  ;;  %v2006_v8 = vld [vmem:[%s3167_s4] ss:$0 sm:$0xff]  ;;  %s2549_s25 = smov 96   ;;  %s2550_s26 = smov 88   ;;  %vm177_vm2 = vcmask 64512   ;;  %vm270_vm3 = vcmask 146432  }
   0x8   :  { %2186 = vmatprep.subr.mxu1 %v2547_v1  ;;  %s2551_s4 = smov 120   ;;  %s3186_s29 = sld [smem:[#allocation6_spill]]  ;;  %vm277_vm4 = vcmask 140288   ;;  %vm322_vm5 = vcmask 1041408   ;;  %vm1496_vm6 = vcmask 254976   ;;  %vm1978_vm7 = vcmask 9216  }
   0x9   :  { %2187 = vmatpush3.msra.mxu1 %v64_v3  ;;  %s2553_s20 = smov 56   ;;  %s2554_s3 = smov 80  }
   0xa   :  { %2188 = vmatprep.subr.mxu1 %v2547_v1  ;;  %s2555_s21 = smov 112   ;;  %s2558_s27 = smov 104  }
   0xb   :  { %2189 = vmatpush3.msra.mxu1 %v63_v4  ;;  %s2559_s0 = smov 40  }
   0xc   :  { %v2674_v5 = vld [vmem:[%s3185_s1] sm:$0xff]  ;;  %2199 = vmatprep.subr.mxu1 %v2547_v1  ;;  %v2685_v6 = vld [vmem:[%s3185_s1 + $0x8] sm:$0xff]  ;;  %v2694_v7 = vld [vmem:[%s3185_s1 + $0x10] sm:$0x3]  ;;  %s2552_s1 = smov 64  }
   0xd   :  { %2191 = vmatmul.mubr.msk.f32.vlgmr.msra.gmra.mxu1 %vm78_vm1, %v2674_v5 }
   0xe   :  { %2193 = vmatprep.mubr.msk.f32.mxu1 %vm2548_vm0, %v2547_v1  ;;  %v2754_v27 = vld [vmem:[%s3186_s29] sm:$0xff]  ;;  %v2760_v31 = vld [vmem:[%s3186_s29 + $0x8] sm:$0xff]  ;;  %v2767_v36 = vld [vmem:[%s3186_s29 + $0x10] sm:$0x3] }
  0x11   :  { %2194 = vmatmul.mubr.msk.f32.gmra.mxu1 %vm78_vm1, %v2685_v6 }
  0x12   :  { %2196 = vmatprep.mubr.msk.f32.mxu1 %vm2548_vm0, %v2547_v1 }
  0x15   :  { %2197 = vmatmul.mubr.msk.f32.gmra.mxu1 %vm78_vm1, %v2694_v7 }
  0x16   :  { %2205 = vmatprep.mubr.msk.f32.mxu1 %vm2548_vm0, %v2547_v1 }
  0xcd   :  { %v154_v9 = vpop.f32.mrf.mxu1 }
  0xce   :  { %v2703_v10 = vadd.f32 %v2006_v8, %v154_v9 }
  0xcf   :  { %v2192_v11 = vpop.f32.mrf.mxu1 }
  0xd0   :  { %171 = vrot.lane.b32.xlu1 %v2703_v10, %s2549_s25 }
  0xd1   :  { %v159_v12 = vpop.f32.mrf.mxu1 }
  0xd2   :  { %v2710_v17 = vadd.f32 %v2006_v8, %v159_v12 }
  0xd3   :  { %v2195_v13 = vpop.f32.mrf.mxu1 }
  0xd5   :  { %v164_v14 = vpop.f32.mrf.mxu1 }
  0xd6   :  { %v2706_v15 = vadd.f32 %v2006_v8, %v164_v14 }
  0xd7   :  { %v2198_v16 = vpop.f32.mrf.mxu1 }
  0xd8   :  { %415 = vrot.lane.b32.xlu1 %v2706_v15, %s2550_s26  ;;  %175 = vrot.lane.b32.xlu0 %v2706_v15, %s2549_s25 }
  0xdc   :  { %411 = vrot.lane.b32.xlu1 %v2703_v10, %s2550_s26  ;;  %173 = vrot.lane.b32.xlu0 %v2710_v17, %s2549_s25 }
  0xe0   :  { %407 = vrot.lane.b32.xlu1 %v2710_v17, %s2551_s4  ;;  %413 = vrot.lane.b32.xlu0 %v2710_v17, %s2550_s26  ;;  %s2556_s26 = smov 48  }
  0xe4   :  { %405 = vrot.lane.b32.xlu0 %v2703_v10, %s2551_s4 }
  0xe8   :  { %409 = vrot.lane.b32.xlu0 %v2706_v15, %s2551_s4  ;;  %s2557_s4 = smov 72  }
 0x142   :  { %v172_v20 = vpop.permute.xlu1 %171 }
 0x14a   :  { %v176_v18 = vpop.permute.xlu0 %175  ;;  %v416_v21 = vpop.permute.xlu1 %415 }
 0x14b   :  { %2200 = vmatpush3.xpose.msk.msra.mxu1 %vm177_vm2, %v176_v18 }
 0x14c   :  { %2201 = vmatprep.subr.mxu1 %v2547_v1 }
 0x14e   :  { %v174_v19 = vpop.permute.xlu0 %173  ;;  %v412_v23 = vpop.permute.xlu1 %411 }
 0x14f   :  { %2202 = vmatpush3.xpose.msk.msra.mxu1 %vm177_vm2, %v174_v19 }
 0x150   :  { %2203 = vmatprep.subr.mxu1 %v2547_v1 }
 0x152   :  { %v414_v22 = vpop.permute.xlu0 %413  ;;  %v408_v25 = vpop.permute.xlu1 %407 }
 0x153   :  { %2204 = vmatpush3.xpose.msk.msra.mxu1 %vm177_vm2, %v172_v20 }
 0x154   :  { %2229 = vmatprep.subr.mxu1 %v2547_v1 }
 0x156   :  { %2206 = vmatmul.mubr.msk.f32.vlgmr.msra.gmra.mxu1 %vm177_vm2, %v2703_v10  ;;  %v406_v24 = vpop.permute.xlu0 %405 }
 0x157   :  { %2230 = vmatpush3.xpose.msk.msra.mxu1 %vm177_vm2, %v416_v21  ;;  %2208 = vmatprep.mubr.msk.f32.mxu1 %vm2548_vm0, %v2547_v1 }
 0x158   :  { %2231 = vmatprep.subr.mxu1 %v2547_v1 }
 0x15a   :  { %2209 = vmatmul.mubr.msk.f32.gmra.mxu1 %vm177_vm2, %v2710_v17  ;;  %v410_v26 = vpop.permute.xlu0 %409 }
 0x15b   :  { %2232 = vmatpush3.xpose.msk.msra.mxu1 %vm177_vm2, %v414_v22  ;;  %2211 = vmatprep.mubr.msk.f32.mxu1 %vm2548_vm0, %v2547_v1 }
 0x15c   :  { %2233 = vmatprep.subr.mxu1 %v2547_v1 }
 0x15e   :  { %2212 = vmatmul.mubr.msk.f32.gmra.mxu1 %vm177_vm2, %v2706_v15 }
 0x15f   :  { %2234 = vmatpush3.xpose.msk.msra.mxu1 %vm177_vm2, %v412_v23  ;;  %2235 = vmatprep.mubr.msk.f32.mxu1 %vm2548_vm0, %v2547_v1 }
 0x160   :  { %2259 = vmatprep.subr.mxu1 %v2547_v1 }
 0x162   :  { %2236 = vmatmul.mubr.msk.f32.vlgmr.msra.gmra.mxu1 %vm177_vm2, %v406_v24 }
 0x163   :  { %2238 = vmatprep.mubr.msk.f32.mxu1 %vm2548_vm0, %v2547_v1 }
 0x166   :  { %2239 = vmatmul.mubr.msk.f32.gmra.mxu1 %vm177_vm2, %v408_v25 }
 0x167   :  { %2241 = vmatprep.mubr.msk.f32.mxu1 %vm2548_vm0, %v2547_v1 }
 0x16a   :  { %2242 = vmatmul.mubr.msk.f32.gmra.mxu1 %vm177_vm2, %v410_v26 }
 0x16b   :  { %2261 = vmatprep.mubr.msk.f32.mxu1 %vm2548_vm0, %v2547_v1 }
 0x216   :  { %v256_v28 = vpop.f32.mrf.mxu1 }
 0x217   :  { %v257_v29 = vadd.f32 %v256_v28, %v2754_v27 }
 0x218   :  { %v2207_v30 = vpop.f32.mrf.mxu1 }
 0x219   :  { %v271_v32 = vsel %vm270_vm3, %v257_v29, -inf }
 0x21a   :  { %272 = vmax.xlane.f32.xlu1 %v271_v32  ;;  %v261_v33 = vpop.f32.mrf.mxu1 }
 0x21b   :  { %v262_v34 = vadd.f32 %v261_v33, %v2760_v31 }
 0x21c   :  { %v2210_v35 = vpop.f32.mrf.mxu1 }
 0x21d   :  { %v274_v37 = vsel %vm270_vm3, %v262_v34, -inf }
 0x21e   :  { %275 = vmax.xlane.f32.xlu0 %v274_v37  ;;  %v266_v38 = vpop.f32.mrf.mxu1 }
 0x21f   :  { %v267_v39 = vadd.f32 %v266_v38, %v2767_v36 }
 0x220   :  { %v2213_v40 = vpop.f32.mrf.mxu1 }
 0x221   :  { %v278_v41 = vsel %vm277_vm4, %v267_v39, -inf }
 0x222   :  { %279 = vmax.xlane.f32.xlu0 %v278_v41  ;;  %v495_v42 = vpop.f32.mrf.mxu1 }
 0x223   :  { %v496_v43 = vadd.f32 %v495_v42, %v2754_v27 }
 0x224   :  { %v2237_v44 = vpop.f32.mrf.mxu1 }
 0x225   :  { %v509_v45 = vsel %vm270_vm3, %v496_v43, -inf }
 0x226   :  { %510 = vmax.xlane.f32.xlu1 %v509_v45  ;;  %v500_v46 = vpop.f32.mrf.mxu1 }
 0x227   :  { %v501_v47 = vadd.f32 %v500_v46, %v2760_v31 }
 0x228   :  { %v2240_v48 = vpop.f32.mrf.mxu1 }
 0x229   :  { %v512_v49 = vsel %vm270_vm3, %v501_v47, -inf }
 0x22a   :  { %513 = vmax.xlane.f32.xlu0 %v512_v49  ;;  %v505_v50 = vpop.f32.mrf.mxu1 }
 0x22b   :  { %v506_v51 = vadd.f32 %v505_v50, %v2767_v36 }
 0x22c   :  { %v2243_v52 = vpop.f32.mrf.mxu1 }
 0x22d   :  { %v515_v53 = vsel %vm277_vm4, %v506_v51, -inf }
 0x22e   :  { %516 = vmax.xlane.f32.xlu1 %v515_v53 }
 0x23f   :  { %307 = vrot.lane.b32.xlu1 %v2710_v17, %s2552_s1 }
 0x240   :  { %309 = vrot.lane.b32.xlu0 %v2706_v15, %s2552_s1 }
 0x243   :  { %305 = vrot.lane.b32.xlu1 %v2703_v10, %s2552_s1 }
 0x244   :  { %546 = vrot.lane.b32.xlu0 %v2706_v15, %s2553_s20 }
 0x2a3   :  { %v273_v54 = vpop.xlane.xlu1 %272 }
 0x2a4   :  { %v281_v55 = vsub.f32 %v257_v29, %v273_v54  ;;  %v67_v54 = vld [vmem:[%s3168_s5] sm:$0xff] }
 0x2a6   :  { %v284_v56 = vmul.f32 1.442695, %v281_v55  ;;  %v68_v55 = vld [vmem:[%s3168_s5 + $0x8] sm:$0xff] }
 0x2a7   :  { %v276_v57 = vpop.xlane.xlu0 %275  ;;  %2260 = vmatpush3.msra.mxu1 %v68_v55 }
 0x2a8   :  { %2461 = vpow2.f32 %v284_v56  ;;  %v282_v58 = vsub.f32 %v262_v34, %v276_v57  ;;  %2281 = vmatprep.subr.mxu1 %v2547_v1 }
 0x2aa   :  { %v286_v59 = vmul.f32 1.442695, %v282_v58 }
 0x2ab   :  { %v280_v60 = vpop.xlane.xlu0 %279 }
 0x2ac   :  { %2463 = vpow2.f32 %v286_v59  ;;  %v283_v61 = vsub.f32 %v267_v39, %v280_v60 }
 0x2ae   :  { %v288_v62 = vmul.f32 1.442695, %v283_v61 }
 0x2af   :  { %v511_v63 = vpop.xlane.xlu1 %510 }
 0x2b0   :  { %2465 = vpow2.f32 %v288_v62  ;;  %v518_v0 = vsub.f32 %v496_v43, %v511_v63 }
 0x2b2   :  { %v521_v2 = vmul.f32 1.442695, %v518_v0 }
 0x2b3   :  { %v514_v3 = vpop.xlane.xlu0 %513 }
 0x2b4   :  { %2467 = vpow2.f32 %v521_v2  ;;  %v519_v4 = vsub.f32 %v501_v47, %v514_v3 }
 0x2b5   :  { %v2462_v8 = vpop.eup %2461 }
 0x2b6   :  { %v523_v9 = vmul.f32 1.442695, %v519_v4  ;;  %v290_v11 = vsel %vm270_vm3, %v2462_v8, 0.0 }
 0x2b7   :  { %291 = vadd.xlane.f32.xlu0 %v290_v11  ;;  %v310_v12 = vpop.permute.xlu0 %309  ;;  %v517_v13 = vpop.xlane.xlu1 %516 }
 0x2b8   :  { %2469 = vpow2.f32 %v523_v9  ;;  %v520_v14 = vsub.f32 %v506_v51, %v517_v13  ;;  %2215 = vmatpush3.msk.msra.mxu0 %vm322_vm5, %v310_v12 }
 0x2b9   :  { %v2464_v16 = vpop.eup %2463  ;;  %2216 = vmatprep.subr.mxu0 %v2547_v1 }
 0x2ba   :  { %v525_v18 = vmul.f32 1.442695, %v520_v14  ;;  %v293_v19 = vsel %vm270_vm3, %v2464_v16, 0.0 }
 0x2bb   :  { %294 = vadd.xlane.f32.xlu1 %v293_v19  ;;  %v308_v20 = vpop.permute.xlu1 %307  ;;  %v547_v32 = vpop.permute.xlu0 %546 }
 0x2bc   :  { %2471 = vpow2.f32 %v525_v18  ;;  %2217 = vmatpush3.msra.mxu0 %v308_v20 }
 0x2bd   :  { %v2466_v21 = vpop.eup %2465  ;;  %2218 = vmatprep.subr.mxu0 %v2547_v1 }
 0x2be   :  { %v296_v22 = vsel %vm277_vm4, %v2466_v21, 0.0 }
 0x2bf   :  { %297 = vadd.xlane.f32.xlu0 %v296_v22  ;;  %v306_v23 = vpop.permute.xlu1 %305 }
 0x2c0   :  { %2219 = vmatpush3.msra.mxu0 %v306_v23 }
 0x2c1   :  { %v2468_v24 = vpop.eup %2467  ;;  %2244 = vmatprep.subr.mxu0 %v2547_v1 }
 0x2c2   :  { %v527_v25 = vsel %vm270_vm3, %v2468_v24, 0.0 }
 0x2c3   :  { %528 = vadd.xlane.f32.xlu1 %v527_v25 }
 0x2c5   :  { %v2470_v26 = vpop.eup %2469 }
 0x2c6   :  { %v530_v28 = vsel %vm270_vm3, %v2470_v26, 0.0 }
 0x2c7   :  { %531 = vadd.xlane.f32.xlu0 %v530_v28 }
 0x2c9   :  { %v2472_v29 = vpop.eup %2471 }
 0x2ca   :  { %v533_v30 = vsel %vm277_vm4, %v2472_v29, 0.0 }
 0x2cb   :  { %534 = vadd.xlane.f32.xlu1 %v533_v30 }
 0x2dc   :  { %544 = vrot.lane.b32.xlu1 %v2710_v17, %s2553_s20 }
 0x2dd   :  { %542 = vrot.lane.b32.xlu0 %v2703_v10, %s2553_s20 }
 0x2e0   :  { %829 = vrot.lane.b32.xlu1 %v2706_v15, %s2554_s3 }
 0x2e1   :  { %827 = vrot.lane.b32.xlu0 %v2710_v17, %s2554_s3 }
 0x2e4   :  { %825 = vrot.lane.b32.xlu1 %v2703_v10, %s2554_s3 }
 0x2e5   :  { %819 = vrot.lane.b32.xlu0 %v2703_v10, %s2555_s21 }
 0x2e8   :  { %821 = vrot.lane.b32.xlu1 %v2710_v17, %s2555_s21 }
 0x2e9   :  { %823 = vrot.lane.b32.xlu0 %v2706_v15, %s2555_s21 }
 0x340   :  { %v292_v33 = vpop.xlane.xlu0 %291 }
 0x341   :  { %2473 = vrcp.f32 %v292_v33 }
 0x344   :  { %v295_v34 = vpop.xlane.xlu1 %294 }
 0x345   :  { %2475 = vrcp.f32 %v295_v34 }
 0x348   :  { %v298_v35 = vpop.xlane.xlu0 %297 }
 0x349   :  { %2477 = vrcp.f32 %v298_v35 }
 0x34c   :  { %v529_v37 = vpop.xlane.xlu1 %528 }
 0x34d   :  { %2479 = vrcp.f32 %v529_v37 }
 0x34e   :  { %v2474_v38 = vpop.eup %2473 }
 0x34f   :  { %v302_v39 = vmul.f32 %v2474_v38, %v2462_v8 }
 0x350   :  { %v532_v40 = vpop.xlane.xlu0 %531 }
 0x351   :  { %2481 = vrcp.f32 %v532_v40  ;;  %2221 = vmatmul.mubr.msk.f32.vlgmr.msra.gmra.mxu0 %vm270_vm3, %v302_v39 }
 0x352   :  { %v2476_v41 = vpop.eup %2475  ;;  %2245 = vmatpush3.msk.msra.mxu0 %vm322_vm5, %v547_v32  ;;  %2223 = vmatprep.mubr.msk.f32.mxu0 %vm2548_vm0, %v2547_v1 }
 0x353   :  { %v303_v42 = vmul.f32 %v2476_v41, %v2464_v16  ;;  %2246 = vmatprep.subr.mxu0 %v2547_v1 }
 0x354   :  { %v535_v43 = vpop.xlane.xlu1 %534  ;;  %v543_v49 = vpop.permute.xlu0 %542 }
 0x355   :  { %2483 = vrcp.f32 %v535_v43  ;;  %2224 = vmatmul.mubr.msk.f32.gmra.mxu0 %vm270_vm3, %v303_v42 }
 0x356   :  { %v2478_v44 = vpop.eup %2477  ;;  %2226 = vmatprep.mubr.msk.f32.mxu0 %vm2548_vm0, %v2547_v1 }
 0x357   :  { %v304_v45 = vmul.f32 %v2478_v44, %v2466_v21 }
 0x358   :  { %v545_v46 = vpop.permute.xlu1 %544  ;;  %v828_v3 = vpop.permute.xlu0 %827 }
 0x359   :  { %2227 = vmatmul.mubr.msk.f32.gmra.mxu0 %vm270_vm3, %v304_v45 }
 0x35a   :  { %v2480_v47 = vpop.eup %2479  ;;  %2247 = vmatpush3.msra.mxu0 %v545_v46  ;;  %2250 = vmatprep.mubr.msk.f32.mxu0 %vm2548_vm0, %v2547_v1 }
 0x35b   :  { %v539_v48 = vmul.f32 %v2480_v47, %v2468_v24  ;;  %2248 = vmatprep.subr.mxu0 %v2547_v1 }
 0x35c   :  { %2249 = vmatpush3.msra.mxu0 %v543_v49  ;;  %v830_v63 = vpop.permute.xlu1 %829  ;;  %v820_v12 = vpop.permute.xlu0 %819 }
 0x35d   :  { %2251 = vmatmul.mubr.msk.f32.vlgmr.msra.gmra.mxu0 %vm270_vm3, %v539_v48  ;;  %2270 = vmatprep.subr.mxu0 %v2547_v1 }
 0x35e   :  { %v2482_v50 = vpop.eup %2481  ;;  %2253 = vmatprep.mubr.msk.f32.mxu0 %vm2548_vm0, %v2547_v1  ;;  %2271 = vmatpush3.msra.mxu0 %v67_v54 }
 0x35f   :  { %v540_v51 = vmul.f32 %v2482_v50, %v2470_v26  ;;  %2296 = vmatprep.subr.mxu0 %v2547_v1 }
 0x360   :  { %v826_v9 = vpop.permute.xlu1 %825  ;;  %v824_v14 = vpop.permute.xlu0 %823 }
 0x361   :  { %2254 = vmatmul.mubr.msk.f32.gmra.mxu0 %vm270_vm3, %v540_v51 }
 0x362   :  { %v2484_v52 = vpop.eup %2483  ;;  %2256 = vmatprep.mubr.msk.f32.mxu0 %vm2548_vm0, %v2547_v1 }
 0x363   :  { %v541_v53 = vmul.f32 %v2484_v52, %v2472_v29 }
 0x364   :  { %v822_v13 = vpop.permute.xlu1 %821 }
 0x365   :  { %2257 = vmatmul.mubr.msk.f32.gmra.mxu0 %vm270_vm3, %v541_v53 }
 0x366   :  { %2272 = vmatprep.mubr.msk.f32.mxu0 %vm2548_vm0, %v2547_v1 }
 0x411   :  { %v391_v56 = vpop.f32.mrf.mxu0 }
 0x412   :  { %2273 = vmatmul.mubr.msk.f32.vlgmr.msra.gmra.mxu0 %vm177_vm2, %v391_v56 }
 0x413   :  { %v2222_v57 = vpop.f32.mrf.mxu0  ;;  %2275 = vmatprep.mubr.msk.f32.mxu0 %vm2548_vm0, %v2547_v1 }
 0x415   :  { %v396_v58 = vpop.f32.mrf.mxu0 }
 0x416   :  { %2276 = vmatmul.mubr.msk.f32.gmra.mxu0 %vm177_vm2, %v396_v58 }
 0x417   :  { %v2225_v59 = vpop.f32.mrf.mxu0  ;;  %2278 = vmatprep.mubr.msk.f32.mxu0 %vm2548_vm0, %v2547_v1 }
 0x419   :  { %v401_v60 = vpop.f32.mrf.mxu0 }
 0x41a   :  { %2279 = vmatmul.mubr.msk.f32.gmra.mxu0 %vm177_vm2, %v401_v60 }
 0x41b   :  { %v2228_v61 = vpop.f32.mrf.mxu0  ;;  %2302 = vmatprep.mubr.msk.f32.mxu0 %vm2548_vm0, %v2547_v1 }
 0x41d   :  { %v627_v62 = vpop.f32.mrf.mxu0 }
 0x41e   :  { %2262 = vmatmul.mubr.msk.f32.vlgmr.msra.gmra.mxu1 %vm177_vm2, %v627_v62 }
 0x41f   :  { %2282 = vmatpush3.xpose.msk.msra.mxu1 %vm177_vm2, %v830_v63  ;;  %v2252_v0 = vpop.f32.mrf.mxu0  ;;  %2264 = vmatprep.mubr.msk.f32.mxu1 %vm2548_vm0, %v2547_v1 }
 0x420   :  { %2283 = vmatprep.subr.mxu1 %v2547_v1 }
 0x421   :  { %v632_v2 = vpop.f32.mrf.mxu0 }
 0x422   :  { %2265 = vmatmul.mubr.msk.f32.gmra.mxu1 %vm177_vm2, %v632_v2 }
 0x423   :  { %2284 = vmatpush3.xpose.msk.msra.mxu1 %vm177_vm2, %v828_v3  ;;  %v2255_v4 = vpop.f32.mrf.mxu0  ;;  %2267 = vmatprep.mubr.msk.f32.mxu1 %vm2548_vm0, %v2547_v1 }
 0x424   :  { %2285 = vmatprep.subr.mxu1 %v2547_v1 }
 0x425   :  { %v637_v8 = vpop.f32.mrf.mxu0 }
 0x426   :  { %2268 = vmatmul.mubr.msk.f32.gmra.mxu1 %vm177_vm2, %v637_v8 }
 0x427   :  { %2286 = vmatpush3.xpose.msk.msra.mxu1 %vm177_vm2, %v826_v9  ;;  %v2258_v11 = vpop.f32.mrf.mxu0  ;;  %2287 = vmatprep.mubr.msk.f32.mxu1 %vm2548_vm0, %v2547_v1 }
 0x428   :  { %2311 = vmatprep.subr.mxu1 %v2547_v1 }
 0x42a   :  { %2288 = vmatmul.mubr.msk.f32.vlgmr.msra.gmra.mxu1 %vm177_vm2, %v820_v12 }
 0x42b   :  { %2290 = vmatprep.mubr.msk.f32.mxu1 %vm2548_vm0, %v2547_v1 }
 0x42e   :  { %2291 = vmatmul.mubr.msk.f32.gmra.mxu1 %vm177_vm2, %v822_v13 }
 0x42f   :  { %2293 = vmatprep.mubr.msk.f32.mxu1 %vm2548_vm0, %v2547_v1 }
 0x432   :  { %2294 = vmatmul.mubr.msk.f32.gmra.mxu1 %vm177_vm2, %v824_v14 }
 0x433   :  { %2313 = vmatprep.mubr.msk.f32.mxu1 %vm2548_vm0, %v2547_v1 }
 0x4d2   :  { %v805_v16 = vpop.f32.mrf.mxu0 }
 0x4d4   :  { %v2274_v18 = vpop.f32.mrf.mxu0 }
 0x4d6   :  { %v810_v19 = vpop.f32.mrf.mxu0 }
 0x4d8   :  { %v2277_v20 = vpop.f32.mrf.mxu0 }
 0x4da   :  { %v815_v21 = vpop.f32.mrf.mxu0 }
 0x4dc   :  { %v2280_v22 = vpop.f32.mrf.mxu0 }
 0x4de   :  { %v716_v23 = vpop.f32.mrf.mxu1 }
 0x4df   :  { %v2866_v24 = vadd.f32 %v805_v16, %v716_v23  ;;  %v69_v23 = vld [vmem:[%s3168_s5 + $0x10] sm:$0xff] }
 0x4e0   :  { %v2263_v25 = vpop.f32.mrf.mxu1  ;;  %2312 = vmatpush3.msra.mxu1 %v69_v23 }
 0x4e1   :  { %2441 = vmatprep.subr.mxu1 %v2547_v1 }
 0x4e2   :  { %v721_v26 = vpop.f32.mrf.mxu1 }
 0x4e3   :  { %v2868_v28 = vadd.f32 %v810_v19, %v721_v26 }
 0x4e4   :  { %v2266_v29 = vpop.f32.mrf.mxu1 }
 0x4e6   :  { %v726_v30 = vpop.f32.mrf.mxu1 }
 0x4e7   :  { %v2870_v32 = vadd.f32 %v815_v21, %v726_v30 }
 0x4e8   :  { %v2269_v33 = vpop.f32.mrf.mxu1 }
 0x4ea   :  { %v909_v34 = vpop.f32.mrf.mxu1 }
 0x4eb   :  { %v910_v35 = vadd.f32 %v909_v34, %v2754_v27 }
 0x4ec   :  { %v2289_v37 = vpop.f32.mrf.mxu1 }
 0x4ed   :  { %v923_v38 = vsel %vm270_vm3, %v910_v35, -inf }
 0x4ee   :  { %924 = vmax.xlane.f32.xlu1 %v923_v38  ;;  %v914_v39 = vpop.f32.mrf.mxu1 }
 0x4ef   :  { %v915_v40 = vadd.f32 %v914_v39, %v2760_v31 }
 0x4f0   :  { %v2292_v41 = vpop.f32.mrf.mxu1 }
 0x4f1   :  { %v926_v42 = vsel %vm270_vm3, %v915_v40, -inf }
 0x4f2   :  { %927 = vmax.xlane.f32.xlu0 %v926_v42  ;;  %v919_v43 = vpop.f32.mrf.mxu1 }
 0x4f3   :  { %v920_v44 = vadd.f32 %v919_v43, %v2767_v36 }
 0x4f4   :  { %v2295_v45 = vpop.f32.mrf.mxu1 }
 0x4f5   :  { %v929_v46 = vsel %vm277_vm4, %v920_v44, -inf }
 0x4f6   :  { %930 = vmax.xlane.f32.xlu0 %v929_v46 }
 0x4ff   :  { %958 = vrot.lane.b32.xlu1 %v2710_v17, %s2556_s26 }
 0x503   :  { %956 = vrot.lane.b32.xlu1 %v2703_v10, %s2556_s26 }
 0x50c   :  { %960 = vrot.lane.b32.xlu0 %v2706_v15, %s2556_s26 }
 0x577   :  { %v925_v47 = vpop.xlane.xlu1 %924 }
 0x578   :  { %v932_v48 = vsub.f32 %v910_v35, %v925_v47 }
 0x57a   :  { %v935_v49 = vmul.f32 1.442695, %v932_v48 }
 0x57b   :  { %v928_v50 = vpop.xlane.xlu0 %927  ;;  %v959_v54 = vpop.permute.xlu1 %958 }
 0x57c   :  { %2485 = vpow2.f32 %v935_v49  ;;  %v933_v51 = vsub.f32 %v915_v40, %v928_v50 }
 0x57e   :  { %v937_v52 = vmul.f32 1.442695, %v933_v51 }
 0x57f   :  { %v931_v53 = vpop.xlane.xlu0 %930  ;;  %v957_v56 = vpop.permute.xlu1 %956 }
 0x580   :  { %2487 = vpow2.f32 %v937_v52  ;;  %v934_v61 = vsub.f32 %v920_v44, %v931_v53 }
 0x582   :  { %v939_v62 = vmul.f32 1.442695, %v934_v61 }
 0x583   :  { %v961_v55 = vpop.permute.xlu0 %960 }
 0x584   :  { %2297 = vmatpush3.msk.msra.mxu0 %vm322_vm5, %v961_v55  ;;  %2489 = vpow2.f32 %v939_v62 }
 0x585   :  { %2298 = vmatprep.subr.mxu0 %v2547_v1 }
 0x586   :  { %2299 = vmatpush3.msra.mxu0 %v959_v54 }
 0x587   :  { %2300 = vmatprep.subr.mxu0 %v2547_v1 }
 0x588   :  { %2301 = vmatpush3.msra.mxu0 %v957_v56 }
 0x589   :  { %v2486_v57 = vpop.eup %2485  ;;  %2322 = vmatprep.subr.mxu0 %v2547_v1 }
 0x58a   :  { %v941_v58 = vsel %vm270_vm3, %v2486_v57, 0.0 }
 0x58b   :  { %942 = vadd.xlane.f32.xlu1 %v941_v58 }
 0x58d   :  { %v2488_v59 = vpop.eup %2487 }
 0x58e   :  { %v944_v60 = vsel %vm270_vm3, %v2488_v59, 0.0 }
 0x58f   :  { %945 = vadd.xlane.f32.xlu0 %v944_v60 }
 0x591   :  { %v2490_v63 = vpop.eup %2489 }
 0x592   :  { %v947_v0 = vsel %vm277_vm4, %v2490_v63, 0.0 }
 0x59c   :  { %1155 = vrot.lane.b32.xlu1 %v2710_v17, %s2557_s4 }
 0x5a5   :  { %1157 = vrot.lane.b32.xlu0 %v2706_v15, %s2557_s4 }
 0x5a9   :  { %1153 = vrot.lane.b32.xlu0 %v2703_v10, %s2557_s4 }
 0x5ad   :  { %1149 = vrot.lane.b32.xlu0 %v2710_v17, %s2558_s27 }
 0x5c0   :  { %948 = vadd.xlane.f32.xlu1 %v947_v0 }
 0x5d1   :  { %1147 = vrot.lane.b32.xlu1 %v2703_v10, %s2558_s27 }
 0x5d5   :  { %1151 = vrot.lane.b32.xlu1 %v2706_v15, %s2558_s27 }
 0x614   :  { %v943_v2 = vpop.xlane.xlu1 %942 }
 0x615   :  { %2491 = vrcp.f32 %v943_v2 }
 0x618   :  { %v946_v3 = vpop.xlane.xlu0 %945  ;;  %v1156_v13 = vpop.permute.xlu1 %1155 }
 0x619   :  { %2493 = vrcp.f32 %v946_v3 }
 0x61c   :  { %v1158_v9 = vpop.permute.xlu0 %1157 }
 0x620   :  { %v1154_v14 = vpop.permute.xlu0 %1153 }
 0x622   :  { %v2492_v4 = vpop.eup %2491 }
 0x623   :  { %v953_v8 = vmul.f32 %v2492_v4, %v2486_v57 }
 0x624   :  { %v1150_v21 = vpop.permute.xlu0 %1149 }
 0x625   :  { %2303 = vmatmul.mubr.msk.f32.vlgmr.msra.gmra.mxu0 %vm270_vm3, %v953_v8 }
 0x626   :  { %v2494_v11 = vpop.eup %2493  ;;  %2323 = vmatpush3.xpose.msk.msra.mxu0 %vm177_vm2, %v1158_v9  ;;  %2305 = vmatprep.mubr.msk.f32.mxu0 %vm2548_vm0, %v2547_v1 }
 0x627   :  { %2324 = vmatprep.subr.mxu0 %v2547_v1  ;;  %v954_v12 = vmul.f32 %v2494_v11, %v2488_v59 }
 0x629   :  { %2306 = vmatmul.mubr.msk.f32.gmra.mxu0 %vm270_vm3, %v954_v12 }
 0x62a   :  { %2325 = vmatpush3.xpose.msk.msra.mxu0 %vm177_vm2, %v1156_v13  ;;  %2308 = vmatprep.mubr.msk.f32.mxu0 %vm2548_vm0, %v2547_v1 }
 0x62b   :  { %2326 = vmatprep.subr.mxu0 %v2547_v1 }
 0x62e   :  { %2327 = vmatpush3.xpose.msk.msra.mxu0 %vm177_vm2, %v1154_v14 }
 0x62f   :  { %2337 = vmatprep.subr.mxu0 %v2547_v1 }
 0x649   :  { %v949_v16 = vpop.xlane.xlu1 %948 }
 0x64a   :  { %2495 = vrcp.f32 %v949_v16 }
 0x64d   :  { %v1148_v20 = vpop.permute.xlu1 %1147 }
 0x651   :  { %v1152_v22 = vpop.permute.xlu1 %1151 }
 0x657   :  { %v2496_v18 = vpop.eup %2495 }
 0x658   :  { %v955_v19 = vmul.f32 %v2496_v18, %v2490_v63  ;;  %v70_v18 = vld [vmem:[%s3168_s5 + $0x18] sm:$0xff] }
 0x65a   :  { %2309 = vmatmul.mubr.msk.f32.gmra.mxu0 %vm270_vm3, %v955_v19 }
 0x65b   :  { %2328 = vmatprep.mubr.msk.f32.mxu0 %vm2548_vm0, %v2547_v1 }
 0x65e   :  { %2329 = vmatmul.mubr.msk.f32.vlgmr.msra.gmra.mxu0 %vm177_vm2, %v1148_v20 }
 0x65f   :  { %2331 = vmatprep.mubr.msk.f32.mxu0 %vm2548_vm0, %v2547_v1 }
 0x662   :  { %2332 = vmatmul.mubr.msk.f32.gmra.mxu0 %vm177_vm2, %v1150_v21 }
 0x663   :  { %2334 = vmatprep.mubr.msk.f32.mxu0 %vm2548_vm0, %v2547_v1 }
 0x666   :  { %2335 = vmatmul.mubr.msk.f32.gmra.mxu0 %vm177_vm2, %v1152_v22 }
 0x667   :  { %2343 = vmatprep.mubr.msk.f32.mxu0 %vm2548_vm0, %v2547_v1 }
 0x6e5   :  { %v1041_v25 = vpop.f32.mrf.mxu0 }
 0x6e6   :  { %2314 = vmatmul.mubr.msk.f32.vlgmr.msra.gmra.mxu1 %vm177_vm2, %v1041_v25 }
 0x6e7   :  { %v2304_v26 = vpop.f32.mrf.mxu0  ;;  %2316 = vmatprep.mubr.msk.f32.mxu1 %vm2548_vm0, %v2547_v1 }
 0x6e9   :  { %v1046_v29 = vpop.f32.mrf.mxu0 }
 0x6ea   :  { %2317 = vmatmul.mubr.msk.f32.gmra.mxu1 %vm177_vm2, %v1046_v29  ;;  %v2062_v29 = vld [vmem:[%s3169_s6] ss:$0 sm:$0xff] }
 0x6eb   :  { %v2307_v30 = vpop.f32.mrf.mxu0  ;;  %2319 = vmatprep.mubr.msk.f32.mxu1 %vm2548_vm0, %v2547_v1 }
 0x71a   :  { %v1051_v33 = vpop.f32.mrf.mxu0 }
 0x71b   :  { %2320 = vmatmul.mubr.msk.f32.gmra.mxu1 %vm177_vm2, %v1051_v33 }
 0x71c   :  { %v2310_v34 = vpop.f32.mrf.mxu0  ;;  %2346 = vmatprep.mubr.msk.f32.mxu1 %vm2548_vm0, %v2547_v1 }
 0x71e   :  { %v1237_v35 = vpop.f32.mrf.mxu0 }
 0x71f   :  { %v1238_v37 = vadd.f32 %v1237_v35, %v2754_v27 }
 0x720   :  { %v2330_v38 = vpop.f32.mrf.mxu0 }
 0x721   :  { %v1251_v39 = vsel %vm270_vm3, %v1238_v37, -inf }
 0x722   :  { %1252 = vmax.xlane.f32.xlu0 %v1251_v39  ;;  %v1242_v40 = vpop.f32.mrf.mxu0 }
 0x723   :  { %v1243_v41 = vadd.f32 %v1242_v40, %v2760_v31 }
 0x724   :  { %v2333_v42 = vpop.f32.mrf.mxu0 }
 0x725   :  { %v1254_v43 = vsel %vm270_vm3, %v1243_v41, -inf }
 0x726   :  { %1255 = vmax.xlane.f32.xlu1 %v1254_v43  ;;  %v1247_v44 = vpop.f32.mrf.mxu0 }
 0x727   :  { %v1248_v45 = vadd.f32 %v1247_v44, %v2767_v36 }
 0x728   :  { %v2336_v46 = vpop.f32.mrf.mxu0 }
 0x729   :  { %v1257_v47 = vsel %vm277_vm4, %v1248_v45, -inf }
 0x72a   :  { %1258 = vmax.xlane.f32.xlu0 %v1257_v47 }
 0x737   :  { %1288 = vrot.lane.b32.xlu1 %v2706_v15, %s2559_s0 }
 0x7a6   :  { %v1130_v27 = vpop.f32.mrf.mxu1 }
 0x7a7   :  { %v2940_v48 = vadd.f32 %v1130_v27, %v2866_v24 }
 0x7a8   :  { %v2315_v31 = vpop.f32.mrf.mxu1 }
 0x7aa   :  { %v1135_v49 = vpop.f32.mrf.mxu1 }
 0x7ab   :  { %v2943_v50 = vadd.f32 %v1135_v49, %v2868_v28  ;;  %v1253_v51 = vpop.xlane.xlu0 %1252 }
 0x7ac   :  { %v1260_v52 = vsub.f32 %v1238_v37, %v1253_v51  ;;  %v2318_v36 = vpop.f32.mrf.mxu1 }
 0x7ae   :  { %v1263_v53 = vmul.f32 1.442695, %v1260_v52 }
 0x7af   :  { %v1256_v54 = vpop.xlane.xlu1 %1255 }
 0x7b0   :  { %2497 = vpow2.f32 %v1263_v53  ;;  %v1261_v55 = vsub.f32 %v1243_v41, %v1256_v54 }
 0x7b2   :  { %v1265_v56 = vmul.f32 1.442695, %v1261_v55 }
 0x7b3   :  { %v1289_v57 = vpop.permute.xlu1 %1288  ;;  %v1259_v58 = vpop.xlane.xlu0 %1258 }
 0x7b4   :  { %2499 = vpow2.f32 %v1265_v56  ;;  %v1262_v15 = vsub.f32 %v1248_v45, %v1259_v58  ;;  %2338 = vmatpush3.msk.msra.mxu0 %vm322_vm5, %v1289_v57  ;;  %2444 = vmatpush3.msk.msra.mxu1 %vm322_vm5, %v1289_v57 }
 0x7b5   :  { %2339 = vmatprep.subr.mxu0 %v2547_v1  ;;  %2442 = vmatprep.subr.mxu1 %v2547_v1 }
 0x7b6   :  { %v1267_v24 = vmul.f32 1.442695, %v1262_v15  ;;  %v1552_v15 = vld [vmem:[%s3172_s9 + $0x18] sm:$0xff] }
 0x7b8   :  { %2501 = vpow2.f32 %v1267_v24  ;;  %v1551_v24 = vld [vmem:[%s3172_s9 + $0x10] sm:$0xff] }
 0x7bd   :  { %v2498_v28 = vpop.eup %2497 }
 0x7be   :  { %v1269_v59 = vsel %vm270_vm3, %v2498_v28, 0.0 }
 0x7bf   :  { %1270 = vadd.xlane.f32.xlu0 %v1269_v59  ;;  %v1549_v59 = vld [vmem:[%s3172_s9] sm:$0xff] }
 0x7c1   :  { %v2500_v60 = vpop.eup %2499 }
 0x7c2   :  { %v1272_v61 = vsel %vm270_vm3, %v2500_v60, 0.0 }
 0x7c3   :  { %1273 = vadd.xlane.f32.xlu1 %v1272_v61  ;;  %v1666_v61 = vld [vmem:[%s3174_s11 + $0x70] sm:$0xff] }
 0x7c5   :  { %v2502_v62 = vpop.eup %2501 }
 0x7c6   :  { %v1275_v63 = vsel %vm277_vm4, %v2502_v62, 0.0 }
 0x7c7   :  { %1276 = vadd.xlane.f32.xlu0 %v1275_v63  ;;  %v1664_v63 = vld [vmem:[%s3174_s11 + $0x60] sm:$0xff] }
 0x7d4   :  { %1284 = vrot.lane.b32.xlu1 %v2703_v10, %s2559_s0 }
 0x7db   :  { %v1140_v0 = vpop.f32.mrf.mxu1 }
 0x7dc   :  { %v1146_v2 = vadd.f32 %v1140_v0, %v2870_v32  ;;  %v1663_v0 = vld [vmem:[%s3174_s11 + $0x58] sm:$0xff] }
 0x7dd   :  { %1286 = vrot.lane.b32.xlu0 %v2710_v17, %s2559_s0  ;;  %v2321_v3 = vpop.f32.mrf.mxu1 }
 0x7de   :  { %v1661_v3 = vld [vmem:[%s3174_s11 + $0x48] sm:$0xff] }
 0x848   :  { %v1271_v4 = vpop.xlane.xlu0 %1270 }
 0x849   :  { %2503 = vrcp.f32 %v1271_v4  ;;  %v1660_v4 = vld [vmem:[%s3174_s11 + $0x40] sm:$0xff] }
 0x84c   :  { %v1274_v8 = vpop.xlane.xlu1 %1273 }
 0x84d   :  { %2505 = vrcp.f32 %v1274_v8  ;;  %v1659_v8 = vld [vmem:[%s3174_s11 + $0x38] sm:$0xff] }
 0x850   :  { %v1277_v9 = vpop.xlane.xlu0 %1276  ;;  %v1285_v13 = vpop.permute.xlu1 %1284 }
 0x851   :  { %2507 = vrcp.f32 %v1277_v9  ;;  %v1658_v9 = vld [vmem:[%s3174_s11 + $0x30] sm:$0xff] }
 0x854   :  { %v1287_v11 = vpop.permute.xlu0 %1286 }
 0x855   :  { %2340 = vmatpush3.msra.mxu0 %v1287_v11  ;;  %2445 = vmatpush3.msra.mxu1 %v1287_v11  ;;  %v1657_v11 = vld [vmem:[%s3174_s11 + $0x28] sm:$0xff] }
 0x856   :  { %v2504_v12 = vpop.eup %2503  ;;  %2341 = vmatprep.subr.mxu0 %v2547_v1  ;;  %2443 = vmatprep.subr.mxu1 %v2547_v1 }
 0x857   :  { %v1281_v10 = vmul.f32 %v2504_v12, %v2498_v28  ;;  %2342 = vmatpush3.msra.mxu0 %v1285_v13  ;;  %2446 = vmatpush3.msra.mxu1 %v1285_v13  ;;  %v1550_v28 = vld [vmem:[%s3172_s9 + $0x8] sm:$0xff]  ;;  %v1656_v12 = vld [vmem:[%s3174_s11 + $0x20] sm:$0xff]  ;;  %v1655_v13 = vld [vmem:[%s3174_s11 + $0x18] sm:$0xff] }
 0x858   :  { %2352 = vmatprep.subr.mxu0 %v2547_v1  ;;  %2363 = vmatprep.subr.mxu1 %v2547_v1 }
 0x859   :  { %2344 = vmatmul.mubr.msk.f32.vlgmr.msra.gmra.mxu0 %vm270_vm3, %v1281_v10 }
 0x85a   :  { %v2506_v17 = vpop.eup %2505  ;;  %2354 = vmatprep.mubr.msk.f32.mxu0 %vm2548_vm0, %v2547_v1  ;;  %2353 = vmatpush3.msra.mxu0 %v70_v18 }
 0x85b   :  { %v1282_v32 = vmul.f32 %v2506_v17, %v2500_v60  ;;  %2380 = vmatprep.subr.mxu0 %v2547_v1  ;;  %v1667_v60 = vld [vmem:[%s3174_s11 + $0x78] sm:$0xff] }
 0x85d   :  { %2347 = vmatmul.mubr.msk.f32.vlgmr.msra.gmra.mxu1 %vm270_vm3, %v1282_v32 }
 0x85e   :  { %v2508_v14 = vpop.eup %2507  ;;  %2349 = vmatprep.mubr.msk.f32.mxu1 %vm2548_vm0, %v2547_v1  ;;  %2364 = vmatpush3.msra.mxu1 %v1552_v15 }
 0x85f   :  { %v1283_v16 = vmul.f32 %v2508_v14, %v2502_v62  ;;  %2365 = vmatprep.subr.mxu1 %v2547_v1  ;;  %v1665_v62 = vld [vmem:[%s3174_s11 + $0x68] sm:$0xff] }
 0x860   :  { %2366 = vmatpush3.msra.mxu1 %v1551_v24 }
 0x861   :  { %2350 = vmatmul.mubr.msk.f32.gmra.mxu1 %vm270_vm3, %v1283_v16  ;;  %2367 = vmatprep.subr.mxu1 %v2547_v1 }
 0x862   :  { %2371 = vmatprep.mubr.msk.f32.mxu1 %vm2548_vm0, %v2547_v1  ;;  %2368 = vmatpush3.msra.mxu1 %v1550_v28 }
 0x863   :  { %2369 = vmatprep.subr.mxu1 %v2547_v1 }
 0x864   :  { %2370 = vmatpush3.msra.mxu1 %v1549_v59 }
 0x865   :  { %2421 = vmatprep.subr.mxu1 %v2547_v1 }
 0x919   :  { %v1369_v19 = vpop.f32.mrf.mxu0 }
 0x91a   :  { %2355 = vmatmul.mubr.msk.f32.vlgmr.msra.gmra.mxu0 %vm177_vm2, %v1369_v19 }
 0x91b   :  { %v2345_v20 = vpop.f32.mrf.mxu0  ;;  %2357 = vmatprep.mubr.msk.f32.mxu0 %vm2548_vm0, %v2547_v1  ;;  %2381 = vmatpush3.msra.mxu0 %v1667_v60 }
 0x91c   :  { %2382 = vmatprep.subr.mxu0 %v2547_v1 }
 0x91d   :  { %v1374_v21 = vpop.f32.mrf.mxu1  ;;  %2383 = vmatpush3.msra.mxu0 %v1666_v61 }
 0x91e   :  { %2358 = vmatmul.mubr.msk.f32.gmra.mxu0 %vm177_vm2, %v1374_v21  ;;  %2384 = vmatprep.subr.mxu0 %v2547_v1 }
 0x91f   :  { %v2348_v22 = vpop.f32.mrf.mxu1  ;;  %2360 = vmatprep.mubr.msk.f32.mxu0 %vm2548_vm0, %v2547_v1  ;;  %2385 = vmatpush3.msra.mxu0 %v1665_v62 }
 0x920   :  { %2386 = vmatprep.subr.mxu0 %v2547_v1 }
 0x921   :  { %v1379_v23 = vpop.f32.mrf.mxu1  ;;  %2387 = vmatpush3.msra.mxu0 %v1664_v63 }
 0x922   :  { %2361 = vmatmul.mubr.msk.f32.gmra.mxu0 %vm177_vm2, %v1379_v23  ;;  %2388 = vmatprep.subr.mxu0 %v2547_v1  ;;  %v2063_v23 = vld [vmem:[%s3170_s7] ss:$0 sm:$0xff] }
 0x923   :  { %v2351_v25 = vpop.f32.mrf.mxu1  ;;  %2412 = vmatprep.mubr.msk.f32.mxu0 %vm2548_vm0, %v2547_v1  ;;  %2389 = vmatpush3.msra.mxu0 %v1663_v0 }
 0x924   :  { %2390 = vmatprep.subr.mxu0 %v2547_v1 }
 0x9da   :  { %v1458_v26 = vpop.f32.mrf.mxu0 }
 0x9db   :  { %v1472_v30 = vadd.f32 %v1458_v26, %v2940_v48  ;;  %v2064_v26 = vld [vmem:[%s3171_s8] ss:$0 sm:$0xff] }
 0x9dc   :  { %v2356_v33 = vpop.f32.mrf.mxu0 }
 0x9dd   :  { %v1482_v34 = vadd.f32 %v2062_v29, %v1472_v30 }
 0x9de   :  { %v1463_v35 = vpop.f32.mrf.mxu0 }
 0x9df   :  { %v1473_v37 = vadd.f32 %v1463_v35, %v2943_v50  ;;  %v1485_v38 = vadd.f32 %v1482_v34, %v2674_v5 }
 0x9e0   :  { %v2359_v39 = vpop.f32.mrf.mxu0 }
 0x9e1   :  { %v1483_v40 = vadd.f32 %v2062_v29, %v1473_v37  ;;  %v1490_v41 = vsel %vm78_vm1, %v1485_v38, 0.0 }
 0x9e2   :  { %1491 = vadd.xlane.f32.xlu1 %v1490_v41  ;;  %v1468_v42 = vpop.f32.mrf.mxu0 }
 0x9e3   :  { %v1474_v43 = vadd.f32 %v1468_v42, %v1146_v2  ;;  %v1486_v44 = vadd.f32 %v1483_v40, %v2685_v6  ;;  %v1662_v2 = vld [vmem:[%s3174_s11 + $0x50] sm:$0xff] }
 0x9e4   :  { %v2362_v45 = vpop.f32.mrf.mxu0  ;;  %2391 = vmatpush3.msra.mxu0 %v1662_v2  ;;  %v1654_v42 = vld [vmem:[%s3174_s11 + $0x10] sm:$0xff] }
 0x9e5   :  { %v1484_v46 = vadd.f32 %v2062_v29, %v1474_v43  ;;  %v1493_v47 = vsel %vm78_vm1, %v1486_v44, 0.0  ;;  %2392 = vmatprep.subr.mxu0 %v2547_v1  ;;  %v1653_v43 = vld [vmem:[%s3174_s11 + $0x8] sm:$0xff]  ;;  %v2065_v45 = vld [vmem:[%s3173_s10] ss:$0 sm:$0xff] }
 0x9e6   :  { %1494 = vadd.xlane.f32.xlu0 %v1493_v47  ;;  %2393 = vmatpush3.msra.mxu0 %v1661_v3 }
 0x9e7   :  { %v1487_v27 = vadd.f32 %v1484_v46, %v2694_v7  ;;  %2394 = vmatprep.subr.mxu0 %v2547_v1 }
 0x9e8   :  { %2395 = vmatpush3.msra.mxu0 %v1660_v4 }
 0x9e9   :  { %v1497_v48 = vsel %vm1496_vm6, %v1487_v27, 0.0  ;;  %2396 = vmatprep.subr.mxu0 %v2547_v1 }
 0x9ea   :  { %1498 = vadd.xlane.f32.xlu0 %v1497_v48  ;;  %2397 = vmatpush3.msra.mxu0 %v1659_v8 }
 0x9eb   :  { %2398 = vmatprep.subr.mxu0 %v2547_v1 }
 0x9ec   :  { %2399 = vmatpush3.msra.mxu0 %v1658_v9 }
 0x9ed   :  { %2400 = vmatprep.subr.mxu0 %v2547_v1 }
 0x9ee   :  { %2401 = vmatpush3.msra.mxu0 %v1657_v11 }
 0x9ef   :  { %2402 = vmatprep.subr.mxu0 %v2547_v1 }
 0x9f0   :  { %2403 = vmatpush3.msra.mxu0 %v1656_v12 }
 0x9f1   :  { %2404 = vmatprep.subr.mxu0 %v2547_v1 }
 0x9f2   :  { %2405 = vmatpush3.msra.mxu0 %v1655_v13 }
 0x9f3   :  { %2406 = vmatprep.subr.mxu0 %v2547_v1 }
 0x9f4   :  { %2407 = vmatpush3.msra.mxu0 %v1654_v42 }
 0x9f5   :  { %2408 = vmatprep.subr.mxu0 %v2547_v1 }
 0x9f6   :  { %2409 = vmatpush3.msra.mxu0 %v1653_v43  ;;  %v2071_v43 = vld [vmem:[%s3177_s14] ss:$0 sm:$0xff] }
 0x9f7   :  { %2410 = vmatprep.subr.mxu0 %v2547_v1 }
 0xa6b   :  { %v1492_v5 = vpop.xlane.xlu1 %1491 }
 0xa6c   :  { %v1501_v31 = vmul.f32 0.03125, %v1492_v5 }
 0xa6e   :  { %v2994_v49 = vsub.f32 %v1485_v38, %v1501_v31 }
 0xa6f   :  { %v1495_v50 = vpop.xlane.xlu0 %1494 }
 0xa70   :  { %v1502_v51 = vmul.f32 0.03125, %v1495_v50  ;;  %v1507_v6 = vmul.f32 %v2994_v49, %v2994_v49 }
 0xa72   :  { %v2998_v52 = vsub.f32 %v1486_v44, %v1502_v51  ;;  %v1510_v36 = vsel %vm78_vm1, %v1507_v6, 0.0  ;;  %v1652_v44 = vld [vmem:[%s3174_s11] sm:$0xff] }
 0xa73   :  { %1511 = vadd.xlane.f32.xlu1 %v1510_v36  ;;  %v1499_v53 = vpop.xlane.xlu0 %1498  ;;  %2411 = vmatpush3.msra.mxu0 %v1652_v44 }
 0xa74   :  { %v1503_v54 = vmul.f32 0.03125, %v1499_v53  ;;  %v1508_v7 = vmul.f32 %v2998_v52, %v2998_v52 }
 0xa76   :  { %v3003_v55 = vsub.f32 %v1487_v27, %v1503_v54  ;;  %v1513_v56 = vsel %vm78_vm1, %v1508_v7, 0.0  ;;  %v2069_v7 = vld [vmem:[%s3175_s12] ss:$0 sm:$0xff] }
 0xa77   :  { %1514 = vadd.xlane.f32.xlu0 %v1513_v56 }
 0xa78   :  { %v1509_v57 = vmul.f32 %v3003_v55, %v3003_v55 }
 0xa7a   :  { %v1516_v58 = vsel %vm1496_vm6, %v1509_v57, 0.0 }
 0xa7b   :  { %1517 = vadd.xlane.f32.xlu1 %v1516_v58 }
 0xafc   :  { %v1512_v10 = vpop.xlane.xlu1 %1511 }
 0xafd   :  { %v1519_v17 = vmul.f32 0.03125, %v1512_v10 }
 0xaff   :  { %v1522_v32 = vadd.f32 1e-05, %v1519_v17 }
 0xb00   :  { %v1515_v14 = vpop.xlane.xlu0 %1514 }
 0xb01   :  { %2509 = vrsqrt.f32 %v1522_v32  ;;  %v1520_v16 = vmul.f32 0.03125, %v1515_v14 }
 0xb03   :  { %v1523_v18 = vadd.f32 1e-05, %v1520_v16 }
 0xb04   :  { %v1518_v19 = vpop.xlane.xlu1 %1517 }
 0xb05   :  { %2511 = vrsqrt.f32 %v1523_v18  ;;  %v1521_v20 = vmul.f32 0.03125, %v1518_v19 }
 0xb07   :  { %v1524_v21 = vadd.f32 1e-05, %v1521_v20 }
 0xb09   :  { %2513 = vrsqrt.f32 %v1524_v21 }
 0xb0e   :  { %v2510_v22 = vpop.eup %2509 }
 0xb0f   :  { %v1528_v25 = vmul.f32 %v2510_v22, %v2994_v49 }
 0xb11   :  { %v1537_v29 = vmul.f32 %v2063_v23, %v1528_v25 }
 0xb12   :  { %v2512_v30 = vpop.eup %2511 }
 0xb13   :  { %v1546_v33 = vadd.f32 %v2064_v26, %v1537_v29  ;;  %v1529_v34 = vmul.f32 %v2512_v30, %v2998_v52 }
 0xb15   :  { %2372 = vmatmul.mubr.msk.f32.vlgmr.msra.gmra.mxu1 %vm78_vm1, %v1546_v33  ;;  %v1538_v35 = vmul.f32 %v2063_v23, %v1529_v34 }
 0xb16   :  { %v2514_v37 = vpop.eup %2513  ;;  %2374 = vmatprep.mubr.msk.f32.mxu1 %vm2548_vm0, %v2547_v1 }
 0xb17   :  { %v1547_v38 = vadd.f32 %v2064_v26, %v1538_v35  ;;  %v1530_v39 = vmul.f32 %v2514_v37, %v3003_v55 }
 0xb19   :  { %2375 = vmatmul.mubr.msk.f32.gmra.mxu1 %vm78_vm1, %v1547_v38  ;;  %v1539_v40 = vmul.f32 %v2063_v23, %v1530_v39 }
 0xb1a   :  { %2377 = vmatprep.mubr.msk.f32.mxu1 %vm2548_vm0, %v2547_v1 }
 0xb1b   :  { %v1548_v41 = vadd.f32 %v2064_v26, %v1539_v40 }
 0xb1d   :  { %2378 = vmatmul.mubr.msk.f32.gmra.mxu1 %vm78_vm1, %v1548_v41 }
 0xb1e   :  { %2427 = vmatprep.mubr.msk.f32.mxu1 %vm2548_vm0, %v2547_v1 }
 0xbd5   :  { %v1635_v46 = vpop.f32.mrf.mxu1 }
 0xbd6   :  { %v1636_v47 = vadd.f32 %v2065_v45, %v1635_v46 }
 0xbd7   :  { %v2373_v27 = vpop.f32.mrf.mxu1 }
 0xbd8   :  { %v1649_v48 = vmax.f32 %v1636_v47, 0.0 }
 0xbd9   :  { %v1640_v5 = vpop.f32.mrf.mxu1 }
 0xbda   :  { %v1641_v31 = vadd.f32 %v2065_v45, %v1640_v5  ;;  %2413 = vmatmul.mubr.f32.vlgmr.msra.gmra.mxu0 %v1649_v48  ;;  %v1817_v48 = vld [vmem:[%s3165_s2] sm:$0x3]  ;;  %v1897_v5 = vld [vmem:[%s3178_s15 + $0x18] sm:$0xff] }
 0xbdb   :  { %v2376_v49 = vpop.f32.mrf.mxu1  ;;  %2415 = vmatprep.mubr.msk.f32.mxu0 %vm2548_vm0, %v2547_v1 }
 0xbdc   :  { %v1650_v50 = vmax.f32 %v1641_v31, 0.0  ;;  %v1896_v31 = vld [vmem:[%s3178_s15 + $0x10] sm:$0xff]  ;;  %v1895_v49 = vld [vmem:[%s3178_s15 + $0x8] sm:$0xff] }
 0xbdd   :  { %v1645_v51 = vpop.f32.mrf.mxu1 }
 0xbde   :  { %v1646_v6 = vadd.f32 %v2065_v45, %v1645_v51  ;;  %2416 = vmatmul.mubr.f32.gmra.mxu0 %v1650_v50  ;;  %v1894_v50 = vld [vmem:[%s3178_s15] sm:$0xff]  ;;  %s2560_s15 = smov [#allocation2]  }
 0xbdf   :  { %v2379_v52 = vpop.f32.mrf.mxu1  ;;  %2418 = vmatprep.mubr.msk.f32.mxu0 %vm2548_vm0, %v2547_v1 }
 0xbe0   :  { %v1651_v36 = vmax.f32 %v1646_v6, 0.0  ;;  %v2074_v52 = vld [vmem:[%s3179_s16] ss:$0 sm:$0xff]  ;;  %s1998_s16 = sshll.u32 %s2560_s15, 4  ;;  %s1999_s16 = int_to_ptr.vmem [resolvable:$true] %s1998_s16 }
 0xbe1   :  { %s2525_s30 = scalar_lea.vmem %s1999_s16, 32  ;;  %p2530_p1 = scmp.lt.s32.totalorder %s1999_s16, %s1999_s16 }
 0xbe2   :  { %2419 = vmatmul.mubr.f32.gmra.mxu0 %v1651_v36  ;;  %p2526_p0 = scmp.ne.s32.totalorder %s1999_s16, %s2525_s30  ;;  %p2531_p2 = scmp.lt.s32.totalorder %s2525_s30, %s2525_s30 }
 0xbe4   :  { %p2532_p3 = por %p2531_p2, %p2530_p1 }
 0xbe6   :  { %p2533_p4 = pnand %p2532_p3, %p2526_p0 }
 0xc9a   :  { %v1741_v53 = vpop.f32.mrf.mxu0 }
 0xc9b   :  { %v1742_v24 = vadd.f32 %v2069_v7, %v1741_v53 }
 0xc9c   :  { %v2414_v54 = vpop.f32.mrf.mxu0 }
 0xc9d   :  { %v1755_v63 = vadd.f32 %v1742_v24, %v1546_v33 }
 0xc9e   :  { %v1746_v55 = vpop.f32.mrf.mxu0 }
 0xc9f   :  { %v1747_v56 = vadd.f32 %v2069_v7, %v1746_v55  ;;  %v1760_v0 = vsel %vm78_vm1, %v1755_v63, 0.0 }
 0xca0   :  { %v2417_v57 = vpop.f32.mrf.mxu0 }
 0xca1   :  { %v1756_v58 = vadd.f32 %v1747_v56, %v1547_v38  ;;  %v2070_v38 = vld [vmem:[%s3176_s13] ss:$0 sm:$0xff] }
 0xca2   :  { %v1751_v15 = vpop.f32.mrf.mxu0 }
 0xca3   :  { %v1752_v28 = vadd.f32 %v2069_v7, %v1751_v15  ;;  %v1763_v59 = vsel %vm78_vm1, %v1756_v58, 0.0 }
 0xca4   :  { %1764 = vadd.xlane.f32.xlu1 %v1763_v59  ;;  %v2420_v60 = vpop.f32.mrf.mxu0 }
 0xca5   :  { %v1757_v61 = vadd.f32 %v1752_v28, %v1548_v41 }
 0xca7   :  { %v1766_v62 = vsel %vm1496_vm6, %v1757_v61, 0.0 }
 0xca8   :  { %1767 = vadd.xlane.f32.xlu0 %v1766_v62 }
 0xcac   :  { %1761 = vadd.xlane.f32.xlu0 %v1760_v0 }
 0xd2d   :  { %v1765_v2 = vpop.xlane.xlu1 %1764 }
 0xd2e   :  { %v1770_v3 = vmul.f32 0.03125, %v1765_v2 }
 0xd30   :  { %v1773_v4 = vsub.f32 %v1756_v58, %v1770_v3 }
 0xd31   :  { %v1768_v8 = vpop.xlane.xlu0 %1767 }
 0xd32   :  { %v1771_v9 = vmul.f32 0.03125, %v1768_v8  ;;  %v1776_v11 = vmul.f32 %v1773_v4, %v1773_v4 }
 0xd34   :  { %v1774_v12 = vsub.f32 %v1757_v61, %v1771_v9  ;;  %v1781_v13 = vsel %vm78_vm1, %v1776_v11, 0.0 }
 0xd35   :  { %1782 = vadd.xlane.f32.xlu0 %v1781_v13  ;;  %v1762_v10 = vpop.xlane.xlu0 %1761 }
 0xd36   :  { %v1769_v17 = vmul.f32 0.03125, %v1762_v10  ;;  %v1777_v32 = vmul.f32 %v1774_v12, %v1774_v12 }
 0xd38   :  { %v1772_v14 = vsub.f32 %v1755_v63, %v1769_v17  ;;  %v1784_v16 = vsel %vm1496_vm6, %v1777_v32, 0.0 }
 0xd39   :  { %1785 = vadd.xlane.f32.xlu1 %v1784_v16 }
 0xd3a   :  { %v1775_v18 = vmul.f32 %v1772_v14, %v1772_v14 }
 0xd3c   :  { %v1778_v19 = vsel %vm78_vm1, %v1775_v18, 0.0 }
 0xd3d   :  { %1779 = vadd.xlane.f32.xlu1 %v1778_v19 }
 0xdbe   :  { %v1783_v20 = vpop.xlane.xlu0 %1782 }
 0xdbf   :  { %v1788_v21 = vmul.f32 0.03125, %v1783_v20 }
 0xdc1   :  { %v1791_v22 = vadd.f32 1e-05, %v1788_v21 }
 0xdc2   :  { %v1786_v23 = vpop.xlane.xlu1 %1785 }
 0xdc3   :  { %2515 = vrsqrt.f32 %v1791_v22  ;;  %v1789_v25 = vmul.f32 0.03125, %v1786_v23 }
 0xdc5   :  { %v1792_v26 = vadd.f32 1e-05, %v1789_v25 }
 0xdc6   :  { %v1780_v29 = vpop.xlane.xlu1 %1779 }
 0xdc7   :  { %2517 = vrsqrt.f32 %v1792_v26  ;;  %v1787_v30 = vmul.f32 0.03125, %v1780_v29 }
 0xdc9   :  { %v1790_v33 = vadd.f32 1e-05, %v1787_v30 }
 0xdcb   :  { %2519 = vrsqrt.f32 %v1790_v33 }
 0xdd0   :  { %v2516_v34 = vpop.eup %2515 }
 0xdd1   :  { %v1797_v35 = vmul.f32 %v2516_v34, %v1773_v4 }
 0xdd3   :  { %v1806_v41 = vmul.f32 %v2070_v38, %v1797_v35 }
 0xdd4   :  { %v2518_v37 = vpop.eup %2517 }
 0xdd5   :  { %v1798_v39 = vmul.f32 %v2518_v37, %v1774_v12  ;;  %v1815_v46 = vadd.f32 %v2071_v43, %v1806_v41 }
 0xdd7   :  { %v1807_v40 = vmul.f32 %v2070_v38, %v1798_v39 }
 0xdd8   :  { %v2520_v42 = vpop.eup %2519 }
 0xdd9   :  { %v1816_v44 = vadd.f32 %v2071_v43, %v1807_v40  ;;  %v1796_v45 = vmul.f32 %v2520_v42, %v1772_v14 }
 0xddb   :  { %2422 = vmatpush3.msk.msra.mxu1 %vm322_vm5, %v1816_v44  ;;  %v1805_v47 = vmul.f32 %v2070_v38, %v1796_v45 }
 0xddc   :  { %2423 = vmatprep.subr.mxu1 %v2547_v1 }
 0xddd   :  { %2424 = vmatpush3.msra.mxu1 %v1815_v46  ;;  %v1814_v27 = vadd.f32 %v2071_v43, %v1805_v47 }
 0xdde   :  { %2425 = vmatprep.subr.mxu1 %v2547_v1 }
 0xddf   :  { %2426 = vmatpush3.msra.mxu1 %v1814_v27 }
 0xde0   :  { %2428 = vmatmul.mubr.msk.f32.vlgmr.msra.gmra.mxu1 %vm270_vm3, %v1817_v48  ;;  %2430 = vmatprep.subr.mxu1 %v2547_v1 }
 0xde1   :  { %2431 = vmatpush3.msra.mxu1 %v1897_v5  ;;  %2438 = vmatprep.mubr.msk.f32.mxu1 %vm2548_vm0, %v2547_v1 }
 0xde2   :  { %2432 = vmatprep.subr.mxu1 %v2547_v1 }
 0xde3   :  { %2433 = vmatpush3.msra.mxu1 %v1896_v31 }
 0xde4   :  { %2434 = vmatprep.subr.mxu1 %v2547_v1 }
 0xde5   :  { %2435 = vmatpush3.msra.mxu1 %v1895_v49 }
 0xde6   :  { %2436 = vmatprep.subr.mxu1 %v2547_v1 }
 0xde7   :  { %2437 = vmatpush3.msra.mxu1 %v1894_v50 }
 0xea0   :  { %v1890_v51 = vpop.f32.mrf.mxu1 }
 0xea1   :  { %2439 = vmatmul.mubr.msk.f32.vlgmr.msra.gmra.mxu1 %vm78_vm1, %v1890_v51 }
 0xea2   :  { %v2429_v6 = vpop.f32.mrf.mxu1 }
 0xf61   :  { %v1974_v36 = vpop.f32.mrf.mxu1 }
 0xf62   :  { %v1975_v53 = vadd.f32 %v2074_v52, %v1974_v36 }
 0xf63   :  { %v2440_v54 = vpop.f32.mrf.mxu1 }
 0xf64   :  { %v1979_v7 = vsel %vm1978_vm7, %v1975_v53, -inf }
 0xf65   :  { %1980 = vmax.xlane.f32.xlu0 %v1979_v7 }
 0xfee   :  { %v1981_v1 = vpop.xlane.xlu0 %1980 }
 0xfef   :  { %v1982_v55 = vsub.f32 %v1975_v53, %v1981_v1 }
 0xff1   :  { %v1983_v56 = vmul.f32 1.442695, %v1982_v55 }
 0xff3   :  { %2521 = vpow2.f32 %v1983_v56 }
0x1000   :  { %v2522_v57 = vpop.eup %2521 }
0x1001   :  { %v1985_v58 = vsel %vm1978_vm7, %v2522_v57, 0.0 }
0x1002   :  { %1986 = vadd.xlane.f32.xlu1 %v1985_v58 }
0x108b   :  { %v1987_v15 = vpop.xlane.xlu1 %1986 }
0x108c   :  { %2523 = vlog2.f32 %v1987_v15 }
0x1099   :  { %v2524_v24 = vpop.eup %2523 }
0x109a   :  { %v1989_v28 = vmul.f32 0.6931472, %v2524_v24 }
0x109c   :  { %v1990_v59 = vsub.f32 %v1982_v55, %v1989_v28 }
0x109e   :  { %1991 = vst.msk [vmem:[#allocation2] sm:$0x3] %vm1978_vm7, %v1990_v59 }
0x109f   :  { %2536 = shalt.err (!%p2533_p4)
}
0x10a0   :  { %2001 = dma.vmem_to_hbm [thread:$0]  %s1999_s16, 32, %s3180_s17, [#allocation3]  }
0x10a1   :  { %2545 = dma.done.wait [#allocation3], 32  }
0x10a2   :  { %2546 = vsyncadd [#allocation3], 4294967264 }
0x10a3   :  { %2005 = vsyncpa [#allocation3], 1 }

</bundles_post_ra>
